<compile_context>
chip_gen: v6e
topology: v6e:2x2x1
jax: 0.10.0
libtpu: 0.0.40
codegen_flags: <defaults>
</compile_context>

<pallas_src>
import functools

import jax
import jax.numpy as jnp
from jax.experimental import pallas as pl
from jax.experimental.pallas import tpu as pltpu


def cnn1d_kernel(x_ref, w1_ref, b1_ref, w2_ref, b2_ref, wfc_ref, bfc_ref,
                 o_ref, *, seq_len):
    rows = x_ref.shape[0]                 # TB * S
    tb = rows // seq_len
    c2 = w2_ref.shape[1]                  # 128

    # Per-row time index within its batch element.  Rows at t==0 / t==S-1 are
    # the conv zero-padding boundaries; masking them also keeps the fused batch
    # elements independent (zeroes wrap-around rows from pltpu.roll).
    t = jax.lax.broadcasted_iota(jnp.int32, (rows, 1), 0) % seq_len

    def shift_prev(v):                    # result[r] = v[r-1], zero at t == 0
        return jnp.where(t == 0, 0.0, pltpu.roll(v, 1, axis=0))

    def shift_next(v):                    # result[r] = v[r+1], zero at t == S-1
        return jnp.where(t == seq_len - 1, 0.0, pltpu.roll(v, rows - 1, axis=0))

    # --- conv1: Conv1d(F -> 64, k=3, pad=1) + ReLU ---------------------------
    # h1[t] = x[t-1]@w1[0] + x[t]@w1[1] + x[t+1]@w1[2] + b1
    # Shifting the 64-lane products (instead of the narrow F=9 input) keeps the
    # rolls on clean f32 tiles and needs no in-kernel im2col.
    xb = x_ref[...].astype(jnp.bfloat16)                       # (rows, F)
    p0 = jnp.dot(xb, w1_ref[0], preferred_element_type=jnp.float32)
    p1 = jnp.dot(xb, w1_ref[1], preferred_element_type=jnp.float32)
    p2 = jnp.dot(xb, w1_ref[2], preferred_element_type=jnp.float32)
    h1 = jnp.maximum(shift_prev(p0) + p1 + shift_next(p2) + b1_ref[...], 0.0)

    # --- conv2: Conv1d(64 -> 128, k=3, pad=1) + ReLU -------------------------
    # Single deep-K matmul: concat [prev, center, next] along lanes -> K = 192,
    # w2 is pre-reshaped on the host to (192, 128) in matching tap order.
    h1cat = jnp.concatenate([shift_prev(h1), h1, shift_next(h1)], axis=-1)
    h2 = jnp.dot(h1cat.astype(jnp.bfloat16), w2_ref[...],
                 preferred_element_type=jnp.float32) + b2_ref[...]
    h2 = jnp.maximum(h2, 0.0)                                   # (rows, 128)

    # --- AdaptiveMaxPool1d(1): max over time within each batch element -------
    # Sublane split (rows, 128) -> (TB, S, 128); relayout-free when S % 8 == 0
    # (true for S=16).  Still correct (just a copy) for other S.
    pooled = jnp.max(h2.reshape(tb, seq_len, c2), axis=1)       # (TB, 128)

    # --- fc: Linear(128 -> NC), lane-dense (NC zero-padded to 128 columns) ---
    out = jnp.dot(pooled.astype(jnp.bfloat16), wfc_ref[...],
                  preferred_element_type=jnp.float32) + bfc_ref[...]
    o_ref[...] = out.astype(o_ref.dtype)                        # (TB, 128)


def _tensorcores_per_device():
    """Best-effort TensorCore count per JAX device (megacore / v7x => 2)."""
    try:
        dev = jax.devices()[0]
    except Exception:  # pragma: no cover - no backend available
        return 1
    n = getattr(dev, "num_cores", None)
    if isinstance(n, int) and n >= 1:
        return n
    kind = str(getattr(dev, "device_kind", "")).lower()
    if any(s in kind for s in ("v7", "7x", "v4", "v5p")):
        return 2
    return 1


def _pick_batch_block(B, S, block_b):
    """Choose the per-program batch tile TB and padded batch Bp."""
    if block_b is not None:
        TB = max(1, min(block_b, B))
    else:
        n_tc = _tensorcores_per_device()
        if n_tc >= 2 and B >= 2:
            # Multi-TC chip: >=1 program per TensorCore, ~256-512 rows each.
            TB = -(-B // n_tc)
            if TB * S > 512:
                TB = max(1, 512 // S)
        else:
            # Single-TC chip (v5e/v6e): one grid step, rows = B*S fills the MXU.
            TB = B
            if TB * S > 4096:             # keep very large batches tiled
                TB = max(1, 4096 // S)
    # Block legality: unless the block covers the whole padded batch, keep TB
    # sublane-aligned so the f32 (TB*S, F) input and (TB, 128) output blocks
    # satisfy the (8, 128) tiling constraint.
    if -(-B // TB) > 1 and TB % 8 != 0:
        TB = ((TB + 7) // 8) * 8
    Bp = -(-B // TB) * TB
    return TB, Bp


def cnn1d_forward(x, params, *, block_b=None):
    """x: (B, S, F) float32.  Returns (B, num_classes) float32."""
    w1, b1, w2, b2, wfc, bfc = params     # w1:(3,F,64) w2:(3,64,128) wfc:(128,NC)
    B, S, F = x.shape
    C1, C2, NC = w1.shape[2], w2.shape[2], wfc.shape[1]
    NCp = max(128, ((NC + 127) // 128) * 128)   # lane-dense output columns

    TB, Bp = _pick_batch_block(B, S, block_b)
    if Bp != B:
        x = jnp.concatenate([x, jnp.zeros((Bp - B, S, F), x.dtype)], axis=0)
    x_rows = x.reshape(Bp * S, F)          # free reshape; bf16 cast done in-kernel

    # Weight packing (tiny; in a real model this is hoisted to init time).
    w1b = w1.astype(jnp.bfloat16)                                 # (3, F, 64)
    w2p = w2.reshape(3 * C1, C2).astype(jnp.bfloat16)             # (192, 128)
    wfcp = jnp.pad(wfc.astype(jnp.bfloat16), ((0, 0), (0, NCp - NC)))
    bfcp = jnp.pad(bfc, ((0, 0), (0, NCp - NC)))

    rows = TB * S
    grid = (Bp // TB,)

    flops = 2 * Bp * S * (3 * F * C1 + 3 * C1 * C2) + 2 * Bp * C2 * NCp
    bytes_accessed = (x_rows.size * 4 + w1b.size * 2 + w2p.size * 2
                      + wfcp.size * 2 + (b1.size + b2.size + bfcp.size) * 4
                      + Bp * NCp * 4)

    out = pl.pallas_call(
        functools.partial(cnn1d_kernel, seq_len=S),
        out_shape=jax.ShapeDtypeStruct((Bp, NCp), jnp.float32),
        grid_spec=pltpu.PrefetchScalarGridSpec(
            num_scalar_prefetch=0,
            grid=grid,
            in_specs=[
                pl.BlockSpec((rows, F), lambda b: (b, 0)),      # x rows (f32)
                pl.BlockSpec((3, F, C1), lambda b: (0, 0, 0)),  # w1 taps (bf16)
                pl.BlockSpec((1, C1), lambda b: (0, 0)),        # b1
                pl.BlockSpec((3 * C1, C2), lambda b: (0, 0)),   # w2 fused (192,128)
                pl.BlockSpec((1, C2), lambda b: (0, 0)),        # b2
                pl.BlockSpec((C2, NCp), lambda b: (0, 0)),      # wfc padded
                pl.BlockSpec((1, NCp), lambda b: (0, 0)),       # bfc padded
            ],
            out_specs=pl.BlockSpec((TB, NCp), lambda b: (b, 0)),
        ),
        compiler_params=pltpu.CompilerParams(
            dimension_semantics=("parallel",),
        ),
        cost_estimate=pl.CostEstimate(
            flops=flops, transcendentals=0, bytes_accessed=bytes_accessed),
    )(x_rows, w1b, b1, w2p, b2, wfcp, bfcp)
    return out[:B, :NC]


def reference_forward(x, params):
    """Pure-JAX f32 reference matching the PyTorch semantics."""
    w1, b1, w2, b2, wfc, bfc = params

    def conv1d_same(h, w, b):        # h: (B, S, Cin), w: (3, Cin, Cout)
        z = jnp.zeros_like(h[:, :1, :])
        h_prev = jnp.concatenate([z, h[:, :-1, :]], axis=1)
        h_next = jnp.concatenate([h[:, 1:, :], z], axis=1)
        return (jnp.einsum("bsc,cd->bsd", h_prev, w[0])
                + jnp.einsum("bsc,cd->bsd", h, w[1])
                + jnp.einsum("bsc,cd->bsd", h_next, w[2]) + b)

    h1 = jnp.maximum(conv1d_same(x, w1, b1), 0.0)
    h2 = jnp.maximum(conv1d_same(h1, w2, b2), 0.0)
    pooled = jnp.max(h2, axis=1)                  # (B, 128)
    return pooled @ wfc + bfc


def init_params(key, num_features=9, num_classes=2):
    k1, k2, k3, k4, k5, k6 = jax.random.split(key, 6)
    # PyTorch Conv1d weight layout is (Cout, Cin, K); we store (K, Cin, Cout)
    # (w_pt.permute(2, 1, 0)) so each tap is a ready-to-matmul (Cin, Cout).
    w1 = 0.1 * jax.random.normal(k1, (3, num_features, 64), jnp.float32)
    b1 = 0.1 * jax.random.normal(k2, (1, 64), jnp.float32)
    w2 = 0.1 * jax.random.normal(k3, (3, 64, 128), jnp.float32)
    b2 = 0.1 * jax.random.normal(k4, (1, 128), jnp.float32)
    # PyTorch Linear weight is (out, in); we store its transpose (in, out).
    wfc = 0.1 * jax.random.normal(k5, (128, num_classes), jnp.float32)
    bfc = 0.1 * jax.random.normal(k6, (1, num_classes), jnp.float32)
    return (w1, b1, w2, b2, wfc, bfc)


if __name__ == "__main__":
    key = jax.random.PRNGKey(0)
    k_x, k_p = jax.random.split(key)

    batch, seq_len, num_features, num_classes = 16, 16, 9, 2
    x = jax.random.normal(k_x, (batch, seq_len, num_features), jnp.float32)
    params = init_params(k_p, num_features=num_features, num_classes=num_classes)

    forward = jax.jit(cnn1d_forward, static_argnames=("block_b",))
    out = jax.block_until_ready(forward(x, params))
    ref = jax.block_until_ready(reference_forward(x, params))

    assert out.shape == (batch, num_classes)
    # Tolerance accounts for bf16 MXU operands (f32 accumulation) vs f32 ref.
    assert jnp.allclose(out, ref, atol=5e-2, rtol=5e-2), \
        float(jnp.max(jnp.abs(out - ref)))

    print("KERNEL_OK")
</pallas_src>

<mosaic_0001>
module attributes {stable_mosaic.version = 11 : i64} {
  func.func @cnn1d_kernel(%arg0: i32, %arg1: memref<256x9xf32, #tpu.memory_space<vmem>>, %arg2: memref<3x9x64xbf16, #tpu.memory_space<vmem>>, %arg3: memref<1x64xf32, #tpu.memory_space<vmem>>, %arg4: memref<192x128xbf16, #tpu.memory_space<vmem>>, %arg5: memref<1x128xf32, #tpu.memory_space<vmem>>, %arg6: memref<128x128xbf16, #tpu.memory_space<vmem>>, %arg7: memref<1x128xf32, #tpu.memory_space<vmem>>, %arg8: memref<16x128xf32, #tpu.memory_space<vmem>>) attributes {dimension_semantics = [#tpu.dimension_semantics<parallel>], iteration_bounds = array<i64: 1>, scalar_prefetch = 0 : i64, scratch_operands = 0 : i64, tpu.core_type = #tpu.core_type<tc>, window_params = [{transform_indices = @transform_0, window_bounds = array<i64: 256, 9>}, {pipeline_mode = #tpu.pipeline_mode<synchronous>, transform_indices = @transform_1, window_bounds = array<i64: 3, 9, 64>}, {pipeline_mode = #tpu.pipeline_mode<synchronous>, transform_indices = @transform_2, window_bounds = array<i64: 1, 64>}, {pipeline_mode = #tpu.pipeline_mode<synchronous>, transform_indices = @transform_3, window_bounds = array<i64: 192, 128>}, {pipeline_mode = #tpu.pipeline_mode<synchronous>, transform_indices = @transform_4, window_bounds = array<i64: 1, 128>}, {pipeline_mode = #tpu.pipeline_mode<synchronous>, transform_indices = @transform_5, window_bounds = array<i64: 128, 128>}, {pipeline_mode = #tpu.pipeline_mode<synchronous>, transform_indices = @transform_6, window_bounds = array<i64: 1, 128>}, {transform_indices = @transform_7, window_bounds = array<i64: 16, 128>}]} {
    %0 = tpu.iota {dimensions = array<i32: 0>} : vector<256x1xi32>
    %c16_i32 = arith.constant 16 : i32
    %c0_i32 = arith.constant 0 : i32
    %1 = arith.cmpi eq, %c16_i32, %c0_i32 : i32
    %c1_i32 = arith.constant 1 : i32
    %2 = arith.select %1, %c1_i32, %c16_i32 : i32
    %3 = vector.broadcast %2 : i32 to vector<256x1xi32>
    %4 = arith.remsi %0, %3 : vector<256x1xi32>
    %c0_i32_0 = arith.constant 0 : i32
    %5 = vector.broadcast %c0_i32_0 : i32 to vector<256x1xi32>
    %6 = arith.cmpi ne, %4, %5 : vector<256x1xi32>
    %c0_i32_1 = arith.constant 0 : i32
    %7 = vector.broadcast %c0_i32_1 : i32 to vector<256x1xi32>
    %8 = arith.cmpi slt, %4, %7 : vector<256x1xi32>
    %c0_i32_2 = arith.constant 0 : i32
    %9 = arith.cmpi slt, %2, %c0_i32_2 : i32
    %10 = vector.broadcast %9 : i1 to vector<256x1xi1>
    %11 = vector.broadcast %10 : vector<256x1xi1> to vector<256x1xi1>
    %12 = arith.xori %8, %11 : vector<256x1xi1>
    %13 = arith.andi %12, %6 : vector<256x1xi1>
    %14 = vector.broadcast %2 : i32 to vector<256x1xi32>
    %15 = arith.addi %4, %14 : vector<256x1xi32>
    %16 = arith.select %13, %15, %4 : vector<256x1xi1>, vector<256x1xi32>
    %c0 = arith.constant 0 : index
    %c0_3 = arith.constant 0 : index
    %17 = vector.load %arg1[%c0, %c0_3] : memref<256x9xf32, #tpu.memory_space<vmem>>, vector<256x9xf32>
    %18 = arith.truncf %17 : vector<256x9xf32> to vector<256x9xbf16>
    %c0_4 = arith.constant 0 : index
    %c0_5 = arith.constant 0 : index
    %c0_6 = arith.constant 0 : index
    %19 = vector.load %arg2[%c0_4, %c0_5, %c0_6] : memref<3x9x64xbf16, #tpu.memory_space<vmem>>, vector<1x9x64xbf16>
    %20 = vector.shape_cast %19 : vector<1x9x64xbf16> to vector<9x64xbf16>
    %cst = arith.constant dense<0.000000e+00> : vector<256x64xf32>
    %21 = tpu.matmul %18, %20, %cst {dimension_numbers = #tpu.dot_dimension_numbers<[1], [0], [0], [1], [0, 0, 1, 1], [], []>} : vector<256x9xbf16>, vector<9x64xbf16>, vector<256x64xf32> -> vector<256x64xf32>
    %c1 = arith.constant 1 : index
    %c0_7 = arith.constant 0 : index
    %c0_8 = arith.constant 0 : index
    %22 = vector.load %arg2[%c1, %c0_7, %c0_8] : memref<3x9x64xbf16, #tpu.memory_space<vmem>>, vector<1x9x64xbf16>
    %23 = vector.shape_cast %22 : vector<1x9x64xbf16> to vector<9x64xbf16>
    %cst_9 = arith.constant dense<0.000000e+00> : vector<256x64xf32>
    %24 = tpu.matmul %18, %23, %cst_9 {dimension_numbers = #tpu.dot_dimension_numbers<[1], [0], [0], [1], [0, 0, 1, 1], [], []>} : vector<256x9xbf16>, vector<9x64xbf16>, vector<256x64xf32> -> vector<256x64xf32>
    %c2 = arith.constant 2 : index
    %c0_10 = arith.constant 0 : index
    %c0_11 = arith.constant 0 : index
    %25 = vector.load %arg2[%c2, %c0_10, %c0_11] : memref<3x9x64xbf16, #tpu.memory_space<vmem>>, vector<1x9x64xbf16>
    %26 = vector.shape_cast %25 : vector<1x9x64xbf16> to vector<9x64xbf16>
    %cst_12 = arith.constant dense<0.000000e+00> : vector<256x64xf32>
    %27 = tpu.matmul %18, %26, %cst_12 {dimension_numbers = #tpu.dot_dimension_numbers<[1], [0], [0], [1], [0, 0, 1, 1], [], []>} : vector<256x9xbf16>, vector<9x64xbf16>, vector<256x64xf32> -> vector<256x64xf32>
    %c0_i32_13 = arith.constant 0 : i32
    %28 = vector.broadcast %c0_i32_13 : i32 to vector<256x1xi32>
    %29 = arith.cmpi eq, %16, %28 : vector<256x1xi32>
    %c1_i32_14 = arith.constant 1 : i32
    %30 = tpu.dynamic_rotate %21 by %c1_i32_14 dim 0 : vector<256x64xf32>, i32 -> vector<256x64xf32>
    %cst_15 = arith.constant 0.000000e+00 : f32
    %31 = vector.shape_cast %29 : vector<256x1xi1> to vector<256x1xi1>
    %32 = vector.broadcast %31 : vector<256x1xi1> to vector<256x64xi1>
    %33 = vector.broadcast %cst_15 : f32 to vector<256x64xf32>
    %34 = arith.select %32, %33, %30 : vector<256x64xi1>, vector<256x64xf32>
    %35 = arith.addf %34, %24 : vector<256x64xf32>
    %c15_i32 = arith.constant 15 : i32
    %36 = vector.broadcast %c15_i32 : i32 to vector<256x1xi32>
    %37 = arith.cmpi eq, %16, %36 : vector<256x1xi32>
    %c255_i32 = arith.constant 255 : i32
    %38 = tpu.dynamic_rotate %27 by %c255_i32 dim 0 : vector<256x64xf32>, i32 -> vector<256x64xf32>
    %cst_16 = arith.constant 0.000000e+00 : f32
    %39 = vector.shape_cast %37 : vector<256x1xi1> to vector<256x1xi1>
    %40 = vector.broadcast %39 : vector<256x1xi1> to vector<256x64xi1>
    %41 = vector.broadcast %cst_16 : f32 to vector<256x64xf32>
    %42 = arith.select %40, %41, %38 : vector<256x64xi1>, vector<256x64xf32>
    %43 = arith.addf %35, %42 : vector<256x64xf32>
    %c0_17 = arith.constant 0 : index
    %c0_18 = arith.constant 0 : index
    %44 = vector.load %arg3[%c0_17, %c0_18] : memref<1x64xf32, #tpu.memory_space<vmem>>, vector<1x64xf32>
    %45 = vector.broadcast %44 : vector<1x64xf32> to vector<256x64xf32>
    %46 = arith.addf %43, %45 : vector<256x64xf32>
    %cst_19 = arith.constant 0.000000e+00 : f32
    %47 = vector.broadcast %cst_19 : f32 to vector<256x64xf32>
    %48 = arith.maximumf %46, %47 : vector<256x64xf32>
    %c0_i32_20 = arith.constant 0 : i32
    %49 = vector.broadcast %c0_i32_20 : i32 to vector<256x1xi32>
    %50 = arith.cmpi eq, %16, %49 : vector<256x1xi32>
    %c1_i32_21 = arith.constant 1 : i32
    %51 = tpu.dynamic_rotate %48 by %c1_i32_21 dim 0 : vector<256x64xf32>, i32 -> vector<256x64xf32>
    %cst_22 = arith.constant 0.000000e+00 : f32
    %52 = vector.shape_cast %50 : vector<256x1xi1> to vector<256x1xi1>
    %53 = vector.broadcast %52 : vector<256x1xi1> to vector<256x64xi1>
    %54 = vector.broadcast %cst_22 : f32 to vector<256x64xf32>
    %55 = arith.select %53, %54, %51 : vector<256x64xi1>, vector<256x64xf32>
    %c15_i32_23 = arith.constant 15 : i32
    %56 = vector.broadcast %c15_i32_23 : i32 to vector<256x1xi32>
    %57 = arith.cmpi eq, %16, %56 : vector<256x1xi32>
    %c255_i32_24 = arith.constant 255 : i32
    %58 = tpu.dynamic_rotate %48 by %c255_i32_24 dim 0 : vector<256x64xf32>, i32 -> vector<256x64xf32>
    %cst_25 = arith.constant 0.000000e+00 : f32
    %59 = vector.shape_cast %57 : vector<256x1xi1> to vector<256x1xi1>
    %60 = vector.broadcast %59 : vector<256x1xi1> to vector<256x64xi1>
    %61 = vector.broadcast %cst_25 : f32 to vector<256x64xf32>
    %62 = arith.select %60, %61, %58 : vector<256x64xi1>, vector<256x64xf32>
    %63 = tpu.concatenate %55, %48, %62 in 1 : vector<256x64xf32>, vector<256x64xf32>, vector<256x64xf32> -> vector<256x192xf32>
    %64 = arith.truncf %63 : vector<256x192xf32> to vector<256x192xbf16>
    %c0_26 = arith.constant 0 : index
    %c0_27 = arith.constant 0 : index
    %65 = vector.load %arg4[%c0_26, %c0_27] : memref<192x128xbf16, #tpu.memory_space<vmem>>, vector<192x128xbf16>
    %cst_28 = arith.constant dense<0.000000e+00> : vector<256x128xf32>
    %66 = tpu.matmul %64, %65, %cst_28 {dimension_numbers = #tpu.dot_dimension_numbers<[1], [0], [0], [1], [0, 0, 1, 1], [], []>} : vector<256x192xbf16>, vector<192x128xbf16>, vector<256x128xf32> -> vector<256x128xf32>
    %c0_29 = arith.constant 0 : index
    %c0_30 = arith.constant 0 : index
    %67 = vector.load %arg5[%c0_29, %c0_30] : memref<1x128xf32, #tpu.memory_space<vmem>>, vector<1x128xf32>
    %68 = vector.broadcast %67 : vector<1x128xf32> to vector<256x128xf32>
    %69 = arith.addf %66, %68 : vector<256x128xf32>
    %cst_31 = arith.constant 0.000000e+00 : f32
    %70 = vector.broadcast %cst_31 : f32 to vector<256x128xf32>
    %71 = arith.maximumf %69, %70 : vector<256x128xf32>
    %72 = vector.shape_cast %71 : vector<256x128xf32> to vector<16x16x128xf32>
    %cst_32 = arith.constant dense<0xFF800000> : vector<16x128xf32>
    %73 = vector.multi_reduction <maximumf>, %72, %cst_32 [1] : vector<16x16x128xf32> to vector<16x128xf32>
    %74 = arith.truncf %73 : vector<16x128xf32> to vector<16x128xbf16>
    %c0_33 = arith.constant 0 : index
    %c0_34 = arith.constant 0 : index
    %75 = vector.load %arg6[%c0_33, %c0_34] : memref<128x128xbf16, #tpu.memory_space<vmem>>, vector<128x128xbf16>
    %cst_35 = arith.constant dense<0.000000e+00> : vector<16x128xf32>
    %76 = tpu.matmul %74, %75, %cst_35 {dimension_numbers = #tpu.dot_dimension_numbers<[1], [0], [0], [1], [0, 0, 1, 1], [], []>} : vector<16x128xbf16>, vector<128x128xbf16>, vector<16x128xf32> -> vector<16x128xf32>
    %c0_36 = arith.constant 0 : index
    %c0_37 = arith.constant 0 : index
    %77 = vector.load %arg7[%c0_36, %c0_37] : memref<1x128xf32, #tpu.memory_space<vmem>>, vector<1x128xf32>
    %78 = vector.broadcast %77 : vector<1x128xf32> to vector<16x128xf32>
    %79 = arith.addf %76, %78 : vector<16x128xf32>
    %c0_38 = arith.constant 0 : index
    %c0_39 = arith.constant 0 : index
    %80 = vector.load %arg8[%c0_38, %c0_39] : memref<16x128xf32, #tpu.memory_space<vmem>>, vector<16x128xf32>
    tpu.vector_store %arg8[%c0_38, %c0_39], %79 {strides = array<i32>} : memref<16x128xf32, #tpu.memory_space<vmem>>, vector<16x128xf32>,
    return
  }
  func.func @transform_0(%arg0: i32) -> (i32, i32) {
    %c0_i32 = arith.constant 0 : i32
    %c0_i32_0 = arith.constant 0 : i32
    return %arg0, %c0_i32 : i32, i32
  }
  func.func @transform_1(%arg0: i32) -> (i32, i32, i32) {
    %c0_i32 = arith.constant 0 : i32
    %c0_i32_0 = arith.constant 0 : i32
    %c0_i32_1 = arith.constant 0 : i32
    %c0_i32_2 = arith.constant 0 : i32
    return %c0_i32, %c0_i32_0, %c0_i32_1 : i32, i32, i32
  }
  func.func @transform_2(%arg0: i32) -> (i32, i32) {
    %c0_i32 = arith.constant 0 : i32
    %c0_i32_0 = arith.constant 0 : i32
    %c0_i32_1 = arith.constant 0 : i32
    return %c0_i32, %c0_i32_0 : i32, i32
  }
  func.func @transform_3(%arg0: i32) -> (i32, i32) {
    %c0_i32 = arith.constant 0 : i32
    %c0_i32_0 = arith.constant 0 : i32
    %c0_i32_1 = arith.constant 0 : i32
    return %c0_i32, %c0_i32_0 : i32, i32
  }
  func.func @transform_4(%arg0: i32) -> (i32, i32) {
    %c0_i32 = arith.constant 0 : i32
    %c0_i32_0 = arith.constant 0 : i32
    %c0_i32_1 = arith.constant 0 : i32
    return %c0_i32, %c0_i32_0 : i32, i32
  }
  func.func @transform_5(%arg0: i32) -> (i32, i32) {
    %c0_i32 = arith.constant 0 : i32
    %c0_i32_0 = arith.constant 0 : i32
    %c0_i32_1 = arith.constant 0 : i32
    return %c0_i32, %c0_i32_0 : i32, i32
  }
  func.func @transform_6(%arg0: i32) -> (i32, i32) {
    %c0_i32 = arith.constant 0 : i32
    %c0_i32_0 = arith.constant 0 : i32
    %c0_i32_1 = arith.constant 0 : i32
    return %c0_i32, %c0_i32_0 : i32, i32
  }
  func.func @transform_7(%arg0: i32) -> (i32, i32) {
    %c0_i32 = arith.constant 0 : i32
    %c0_i32_0 = arith.constant 0 : i32
    return %arg0, %c0_i32 : i32, i32
  }
}

</mosaic_0001>

<bundles_post_ra>
// kernel: cnn1d_forward.1
= control target key start
LH: loop header
LB: loop body
LE: loop exit
PB: predicated region body
PF: predicated region fallthrough
CT: control target
= control target key end

     0   :  { %vm548_vm0 = vcmask 1043456   ;;  %vm549_vm1 = vcmask 1044480   ;;  %v2997_v1 = vmov 65535   ;;  %vm499_vm2 = vcmask 72704   ;;  %s4811_s1 = inlined_call_operand.vmem [shape: bf16[3,9,64], index: 1, kind: input, shape index: {}]   ;;  %s4812_s0 = inlined_call_operand.vmem [shape: f32[256,9], index: 0, kind: input, shape index: {}]   ;;  %s4813_s3 = inlined_call_operand.vmem [shape: bf16[192,128], index: 3, kind: input, shape index: {}]   ;;  %s4814_s2 = inlined_call_operand.vmem [shape: f32[1,64], index: 2, kind: input, shape index: {}]   ;;  %s4815_s5 = inlined_call_operand.vmem [shape: bf16[128,128], index: 5, kind: input, shape index: {}]   ;;  %s4816_s4 = inlined_call_operand.vmem [shape: f32[1,128], index: 4, kind: input, shape index: {}]   ;;  %s4817_s6 = inlined_call_operand.vmem [shape: f32[1,128], index: 6, kind: input, shape index: {}]   ;;  %s4818_s7 = inlined_call_operand.vmem [shape: f32[16,128], index: 7, kind: output, shape index: {}]  }
   0x1   :  { %v2974_v0 = vld [vmem:[%s4811_s1] sm:$0x1f]   ;;  %v550_v2 = vsel %vm548_vm0, 4294967295, %v2997_v1  ;;  %v2975_v5 = vld [vmem:[%s4811_s1 + $0x8] sm:$0x1f]   ;;  %v446_v7 = vld [vmem:[%s4812_s0 + $0x10] sm:$0xff]  ;;  %v27_v57 = vlaneseq }
   0x2   :  { %v444_v3 = vld [vmem:[%s4812_s0] sm:$0xff]  ;;  %v551_v4 = vsel %vm549_vm1, %v550_v2, 0  ;;  %v445_v6 = vld [vmem:[%s4812_s0 + $0x8] sm:$0xff]  ;;  %v447_v10 = vld [vmem:[%s4812_s0 + $0x18] sm:$0xff] }
   0x3   :  { %v553_v8 = vand.u32 %v2974_v0, %v551_v4  ;;  %v3057_v9 = vpack.c.bf16 %v445_v6, %v444_v3  ;;  %v448_v11 = vld [vmem:[%s4812_s0 + $0x20] sm:$0xff]  ;;  %v449_v12 = vld [vmem:[%s4812_s0 + $0x28] sm:$0xff]  ;;  %v725_v13 = vand.u32 %v2975_v5, %v551_v4  ;;  %v3073_v15 = vpack.c.bf16 %v447_v10, %v446_v7  ;;  %v454_v19 = vld [vmem:[%s4812_s0 + $0x50] sm:$0xff] }
   0x4   :  { %v452_v14 = vld [vmem:[%s4812_s0 + $0x40] sm:$0xff]  ;;  %v453_v16 = vld [vmem:[%s4812_s0 + $0x48] sm:$0xff]  ;;  %v3078_v17 = vpack.c.bf16 %v449_v12, %v448_v11  ;;  %v455_v20 = vld [vmem:[%s4812_s0 + $0x58] sm:$0xff]  ;;  %v3225_v59 = vshrl.u32 %v27_v57, 7 }
   0x5   :  { %2765 = vmatprep.subr.bf16.mxu0 %v553_v8  ;;  %2767 = vmatprep.mubr.msk.bf16.mxu0 %vm499_vm2, %v3057_v9  ;;  %v3080_v18 = vpack.c.bf16 %v453_v16, %v452_v14  ;;  %v456_v21 = vld [vmem:[%s4812_s0 + $0x60] sm:$0xff]  ;;  %v457_v22 = vld [vmem:[%s4812_s0 + $0x68] sm:$0xff]  ;;  %v3098_v23 = vpack.c.bf16 %v455_v20, %v454_v19  ;;  %v450_v24 = vld [vmem:[%s4812_s0 + $0x30] sm:$0xff] }
   0x6   :  { %2766 = vmatpush3.bf16.msra.mxu0 %v553_v8  ;;  %2887 = vmatprep.subr.bf16.mxu1 %v725_v13  ;;  %v451_v25 = vld [vmem:[%s4812_s0 + $0x38] sm:$0xff]  ;;  %v3108_v26 = vpack.c.bf16 %v457_v22, %v456_v21  ;;  %v2976_v28 = vld [vmem:[%s4811_s1 + $0x10] sm:$0x1f]   ;;  %v460_v31 = vld [vmem:[%s4812_s0 + $0x80] sm:$0xff]  ;;  %vm4829_vm3 = vcmp.lt.s32.totalorder %v3225_v59, 1 }
   0x7   :  { %2799 = vmatprep.subr.bf16.mxu0 %v725_v13  ;;  %2888 = vmatpush3.bf16.msra.mxu1 %v725_v13  ;;  %v479_v27 = vpack.c.bf16 %v451_v25, %v450_v24  ;;  %v458_v29 = vld [vmem:[%s4812_s0 + $0x70] sm:$0xff]  ;;  %v459_v30 = vld [vmem:[%s4812_s0 + $0x78] sm:$0xff]  ;;  %v461_v32 = vld [vmem:[%s4812_s0 + $0x88] sm:$0xff]  ;;  %v897_v33 = vand.u32 %v2976_v28, %v551_v4 }
   0x8   :  { %2809 = vmatprep.mubr.msk.bf16.mxu1 %vm499_vm2, %v3080_v18  ;;  %v483_v34 = vpack.c.bf16 %v459_v30, %v458_v29  ;;  %v484_v35 = vpack.c.bf16 %v461_v32, %v460_v31  ;;  %v462_v36 = vld [vmem:[%s4812_s0 + $0x90] sm:$0xff]  ;;  %v463_v37 = vld [vmem:[%s4812_s0 + $0x98] sm:$0xff]  ;;  %v464_v38 = vld [vmem:[%s4812_s0 + $0xa0] sm:$0xff] }
   0x9   :  { %2768 = vmatmul.mubr.msk.bf16.vlgmr.msra.gmra.mxu0 %vm499_vm2, %v3073_v15  ;;  %v465_v39 = vld [vmem:[%s4812_s0 + $0xa8] sm:$0xff]  ;;  %v485_v40 = vpack.c.bf16 %v463_v37, %v462_v36  ;;  %v466_v42 = vld [vmem:[%s4812_s0 + $0xb0] sm:$0xff]  ;;  %v467_v43 = vld [vmem:[%s4812_s0 + $0xb8] sm:$0xff] }
   0xa   :  { %2800 = vmatpush3.bf16.msra.mxu0 %v725_v13  ;;  %2771 = vmatprep.mubr.msk.bf16.mxu0 %vm499_vm2, %v3078_v17  ;;  %v486_v41 = vpack.c.bf16 %v465_v39, %v464_v38  ;;  %v468_v44 = vld [vmem:[%s4812_s0 + $0xc0] sm:$0xff]  ;;  %v469_v45 = vld [vmem:[%s4812_s0 + $0xc8] sm:$0xff]  ;;  %v487_v46 = vpack.c.bf16 %v467_v43, %v466_v42  ;;  %v470_v48 = vld [vmem:[%s4812_s0 + $0xd0] sm:$0xff] }
   0xb   :  { %2810 = vmatmul.mubr.msk.bf16.vlgmr.msra.gmra.mxu1 %vm499_vm2, %v3098_v23  ;;  %2833 = vmatprep.subr.bf16.mxu0 %v897_v33  ;;  %v488_v47 = vpack.c.bf16 %v469_v45, %v468_v44  ;;  %v471_v49 = vld [vmem:[%s4812_s0 + $0xd8] sm:$0xff]  ;;  %v472_v50 = vld [vmem:[%s4812_s0 + $0xe0] sm:$0xff]  ;;  %v473_v51 = vld [vmem:[%s4812_s0 + $0xe8] sm:$0xff] }
   0xc   :  { %2813 = vmatprep.mubr.msk.bf16.mxu1 %vm499_vm2, %v3108_v26  ;;  %v489_v52 = vpack.c.bf16 %v471_v49, %v470_v48  ;;  %v490_v53 = vpack.c.bf16 %v473_v51, %v472_v50  ;;  %v474_v54 = vld [vmem:[%s4812_s0 + $0xf0] sm:$0xff]  ;;  %v475_v55 = vld [vmem:[%s4812_s0 + $0xf8] sm:$0xff] }
   0xd   :  { %v491_v56 = vpack.c.bf16 %v475_v55, %v474_v54 }
  0x11   :  { %2772 = vmatmul.mubr.msk.bf16.gmra.mxu0 %vm499_vm2, %v479_v27 }
  0x12   :  { %2775 = vmatprep.mubr.msk.bf16.mxu0 %vm499_vm2, %v3080_v18 }
  0x13   :  { %2814 = vmatmul.mubr.msk.bf16.gmra.mxu1 %vm499_vm2, %v483_v34 }
  0x14   :  { %2817 = vmatprep.mubr.msk.bf16.mxu1 %vm499_vm2, %v484_v35 }
  0x19   :  { %2776 = vmatmul.mubr.msk.bf16.gmra.mxu0 %vm499_vm2, %v3098_v23 }
  0x1a   :  { %2779 = vmatprep.mubr.msk.bf16.mxu0 %vm499_vm2, %v3108_v26 }
  0x1b   :  { %2818 = vmatmul.mubr.msk.bf16.gmra.mxu1 %vm499_vm2, %v485_v40 }
  0x1c   :  { %2821 = vmatprep.mubr.msk.bf16.mxu1 %vm499_vm2, %v486_v41 }
  0x21   :  { %2780 = vmatmul.mubr.msk.bf16.gmra.mxu0 %vm499_vm2, %v483_v34 }
  0x22   :  { %2783 = vmatprep.mubr.msk.bf16.mxu0 %vm499_vm2, %v484_v35 }
  0x23   :  { %2822 = vmatmul.mubr.msk.bf16.gmra.mxu1 %vm499_vm2, %v487_v46 }
  0x24   :  { %2825 = vmatprep.mubr.msk.bf16.mxu1 %vm499_vm2, %v488_v47 }
  0x29   :  { %2784 = vmatmul.mubr.msk.bf16.gmra.mxu0 %vm499_vm2, %v485_v40 }
  0x2a   :  { %2787 = vmatprep.mubr.msk.bf16.mxu0 %vm499_vm2, %v486_v41 }
  0x2b   :  { %2826 = vmatmul.mubr.msk.bf16.gmra.mxu1 %vm499_vm2, %v489_v52 }
  0x2c   :  { %2829 = vmatprep.mubr.msk.bf16.mxu1 %vm499_vm2, %v490_v53 }
  0x31   :  { %2788 = vmatmul.mubr.msk.bf16.gmra.mxu0 %vm499_vm2, %v487_v46 }
  0x32   :  { %2791 = vmatprep.mubr.msk.bf16.mxu0 %vm499_vm2, %v488_v47 }
  0x33   :  { %2830 = vmatmul.mubr.msk.bf16.gmra.mxu1 %vm499_vm2, %v491_v56 }
  0x39   :  { %2792 = vmatmul.mubr.msk.bf16.gmra.mxu0 %vm499_vm2, %v489_v52 }
  0x3a   :  { %2795 = vmatprep.mubr.msk.bf16.mxu0 %vm499_vm2, %v490_v53 }
  0x41   :  { %2796 = vmatmul.mubr.msk.bf16.gmra.mxu0 %vm499_vm2, %v491_v56 }
  0x42   :  { %2801 = vmatprep.mubr.msk.bf16.mxu0 %vm499_vm2, %v3057_v9 }
  0x49   :  { %2802 = vmatmul.mubr.msk.bf16.vlgmr.msra.gmra.mxu0 %vm499_vm2, %v3073_v15 }
  0x4a   :  { %2834 = vmatpush3.bf16.msra.mxu0 %v897_v33  ;;  %2805 = vmatprep.mubr.msk.bf16.mxu0 %vm499_vm2, %v3078_v17 }
  0x51   :  { %2806 = vmatmul.mubr.msk.bf16.gmra.mxu0 %vm499_vm2, %v479_v27 }
  0x52   :  { %2835 = vmatprep.mubr.msk.bf16.mxu0 %vm499_vm2, %v3057_v9 }
  0x59   :  { %2836 = vmatmul.mubr.msk.bf16.vlgmr.msra.gmra.mxu0 %vm499_vm2, %v3073_v15 }
  0x5a   :  { %2839 = vmatprep.mubr.msk.bf16.mxu0 %vm499_vm2, %v3078_v17 }
  0x61   :  { %2840 = vmatmul.mubr.msk.bf16.gmra.mxu0 %vm499_vm2, %v479_v27 }
  0x62   :  { %2843 = vmatprep.mubr.msk.bf16.mxu0 %vm499_vm2, %v3080_v18 }
  0x69   :  { %2844 = vmatmul.mubr.msk.bf16.gmra.mxu0 %vm499_vm2, %v3098_v23 }
  0x6a   :  { %2847 = vmatprep.mubr.msk.bf16.mxu0 %vm499_vm2, %v3108_v26 }
  0x71   :  { %2848 = vmatmul.mubr.msk.bf16.gmra.mxu0 %vm499_vm2, %v483_v34 }
  0x72   :  { %2851 = vmatprep.mubr.msk.bf16.mxu0 %vm499_vm2, %v484_v35 }
  0x79   :  { %2852 = vmatmul.mubr.msk.bf16.gmra.mxu0 %vm499_vm2, %v485_v40 }
  0x7a   :  { %2855 = vmatprep.mubr.msk.bf16.mxu0 %vm499_vm2, %v486_v41 }
  0x81   :  { %2856 = vmatmul.mubr.msk.bf16.gmra.mxu0 %vm499_vm2, %v487_v46  ;;  %v4822_v46 = vmov 0  }
  0x82   :  { %2859 = vmatprep.mubr.msk.bf16.mxu0 %vm499_vm2, %v488_v47  ;;  %2117 = vmatprep.subr.bf16.mxu1 %v4822_v46  ;;  %v2977_v47 = vld [vmem:[%s4813_s3 + $0x38] sm:$0xff]  }
  0x83   :  { %2118 = vmatpush1.bf16.msra.mxu1 %v2977_v47 }
  0x84   :  { %2119 = vmatprep.subr.bf16.mxu1 %v4822_v46 }
  0x89   :  { %2860 = vmatmul.mubr.msk.bf16.gmra.mxu0 %vm499_vm2, %v489_v52  ;;  %v2978_v52 = vld [vmem:[%s4813_s3 + $0x30] sm:$0xff]  }
  0x8a   :  { %2863 = vmatprep.mubr.msk.bf16.mxu0 %vm499_vm2, %v490_v53  ;;  %2120 = vmatpush1.bf16.msra.mxu1 %v2978_v52 }
  0x8b   :  { %2121 = vmatprep.subr.bf16.mxu1 %v4822_v46 }
  0x91   :  { %2864 = vmatmul.mubr.msk.bf16.gmra.mxu0 %vm499_vm2, %v491_v56 }
  0xc9   :  { %v2769_v58 = vpop.f32.mrf.mxu0 }
  0xca   :  { %v1094_v0 = vrot.slane %v2769_v58, 7 }
  0xcb   :  { %v3227_v60 = vpop.f32.mrf.mxu0  ;;  %v3229_v61 = vpop.f32.mrf.mxu1 }
  0xcc   :  { %4879 = vst [vmem:[#allocation2_spill] sm:$0xff] %v3227_v60  ;;  %v4819_v3 = vrot.slane %v3227_v60, 7  ;;  %v4943_v60 = vmov 0 }
  0xcd   :  { %v2770_v62 = vpop.f32.mrf.mxu0  ;;  %v3231_v63 = vpop.f32.mrf.mxu1 }
  0xce   :  { %v1095_v1 = vrot.slane %v2770_v62, 7  ;;  %v2979_v62 = vld [vmem:[%s4813_s3 + $0x28] sm:$0xff]  }
  0xcf   :  { %v592_v2 = vpop.f32.mrf.mxu0  ;;  %v3239_v7 = vpop.f32.mrf.mxu1  ;;  %2122 = vmatpush1.bf16.msra.mxu1 %v2979_v62 }
  0xd0   :  { %v1093_v4 = vrot.slane %v592_v2, 7  ;;  %v3237_v5 = vsel %vm4829_vm3, %v1094_v0, %v1095_v1  ;;  %2123 = vmatprep.subr.bf16.mxu1 %v4822_v46 }
  0xd1   :  { %4880 = vst [vmem:[#allocation3_spill] sm:$0xff] %v3237_v5  ;;  %v2773_v6 = vpop.f32.mrf.mxu0  ;;  %v3251_v13 = vpop.f32.mrf.mxu1  ;;  %v46_v5 = vadd.s32 144, %v3225_v59 }
  0xd2   :  { %v3243_v8 = vsel %vm4829_vm3, %v1093_v4, %v1094_v0  ;;  %v3249_v9 = vsel %vm4829_vm3, %v4819_v3, %v1093_v4  ;;  %v1098_v14 = vrot.slane %v2773_v6, 7 }
  0xd3   :  { %4881 = vst [vmem:[#allocation4_spill] sm:$0xff] %v3249_v9  ;;  %v605_v10 = vpop.f32.mrf.mxu0  ;;  %v3261_v21 = vpop.f32.mrf.mxu1 }
  0xd4   :  { %v1096_v11 = vrot.slane %v605_v10, 7 }
  0xd5   :  { %v2774_v12 = vpop.f32.mrf.mxu0  ;;  %v3271_v27 = vpop.f32.mrf.mxu1 }
  0xd6   :  { %v1099_v15 = vrot.slane %v2774_v12, 7  ;;  %v3255_v16 = vsel %vm4829_vm3, %v1095_v1, %v1096_v11 }
  0xd7   :  { %v608_v17 = vpop.f32.mrf.mxu0  ;;  %v3281_v35 = vpop.f32.mrf.mxu1 }
  0xd8   :  { %v1097_v18 = vrot.slane %v608_v17, 7  ;;  %v3259_v19 = vsel %vm4829_vm3, %v1098_v14, %v1099_v15 }
  0xd9   :  { %4882 = vst [vmem:[#allocation5_spill] sm:$0xff] %v3259_v19  ;;  %v2777_v20 = vpop.f32.mrf.mxu0  ;;  %v3291_v41 = vpop.f32.mrf.mxu1 }
  0xda   :  { %v3265_v22 = vsel %vm4829_vm3, %v1097_v18, %v1098_v14  ;;  %v3269_v23 = vsel %vm4829_vm3, %v1096_v11, %v1097_v18  ;;  %v1102_v28 = vrot.slane %v2777_v20, 7  ;;  %v2980_v14 = vld [vmem:[%s4813_s3 + $0x20] sm:$0xff]  }
  0xdb   :  { %4883 = vst [vmem:[#allocation6_spill] sm:$0xff] %v3269_v23  ;;  %v621_v24 = vpop.f32.mrf.mxu0  ;;  %v3305_v51 = vpop.f32.mrf.mxu1  ;;  %2124 = vmatpush1.bf16.msra.mxu1 %v2980_v14  ;;  %v30_v14 = vadd.s32 16, %v3225_v59 }
  0xdc   :  { %v1100_v25 = vrot.slane %v621_v24, 7  ;;  %4884 = vst [vmem:[#allocation7_spill] sm:$0xff] %v3305_v51  ;;  %2125 = vmatprep.subr.bf16.mxu1 %v4822_v46  ;;  %v3551_v51 = vadd.s32 152, %v3225_v59 }
  0xdd   :  { %v2778_v26 = vpop.f32.mrf.mxu0  ;;  %v3319_v58 = vpop.f32.mrf.mxu1 }
  0xde   :  { %v1103_v29 = vrot.slane %v2778_v26, 7  ;;  %v3275_v30 = vsel %vm4829_vm3, %v1099_v15, %v1100_v25  ;;  %v2981_v26 = vld [vmem:[%s4813_s3 + $0x18] sm:$0xff]  }
  0xdf   :  { %v624_v31 = vpop.f32.mrf.mxu0  ;;  %v3333_v11 = vpop.f32.mrf.mxu1  ;;  %2126 = vmatpush1.bf16.msra.mxu1 %v2981_v26  ;;  %v34_v26 = vadd.s32 48, %v3225_v59 }
  0xe0   :  { %v1101_v32 = vrot.slane %v624_v31, 7  ;;  %v3279_v33 = vsel %vm4829_vm3, %v1102_v28, %v1103_v29  ;;  %2127 = vmatprep.subr.bf16.mxu1 %v4822_v46 }
  0xe1   :  { %v2781_v34 = vpop.f32.mrf.mxu0  ;;  %v3347_v24 = vpop.f32.mrf.mxu1  ;;  %v106_v3 = vand.u32 15, %v34_v26  ;;  %v52_v26 = vadd.s32 192, %v3225_v59 }
  0xe2   :  { %v3285_v36 = vsel %vm4829_vm3, %v1101_v32, %v1102_v28  ;;  %v3289_v37 = vsel %vm4829_vm3, %v1100_v25, %v1101_v32  ;;  %v1106_v42 = vrot.slane %v2781_v34, 7 }
  0xe3   :  { %v637_v38 = vpop.f32.mrf.mxu0  ;;  %vm3474_vm9 = vcmp.eq.s32.totalorder %v106_v3, 0  ;;  %v2987_v3 = vld [vmem:[%s4813_s3 + $0x48] sm:$0xff]  }
  0xe4   :  { %v1104_v39 = vrot.slane %v637_v38, 7 }
  0xe5   :  { %v2782_v40 = vpop.f32.mrf.mxu0 }
  0xe6   :  { %v1107_v43 = vrot.slane %v2782_v40, 7  ;;  %v3295_v44 = vsel %vm4829_vm3, %v1103_v29, %v1104_v39 }
  0xe7   :  { %v640_v45 = vpop.f32.mrf.mxu0 }
  0xe8   :  { %v1105_v48 = vrot.slane %v640_v45, 7  ;;  %v3303_v49 = vsel %vm4829_vm3, %v1106_v42, %v1107_v43 }
  0xe9   :  { %v2785_v50 = vpop.f32.mrf.mxu0 }
  0xea   :  { %v3312_v53 = vsel %vm4829_vm3, %v1105_v48, %v1106_v42  ;;  %v3316_v54 = vsel %vm4829_vm3, %v1104_v39, %v1105_v48  ;;  %v1110_v0 = vrot.slane %v2785_v50, 7  ;;  %v3361_v39 = vpop.f32.mrf.mxu1  ;;  %v2982_v42 = vld [vmem:[%s4813_s3 + $0x10] sm:$0xff]  }
  0xeb   :  { %v653_v55 = vpop.f32.mrf.mxu0  ;;  %4887 = vst [vmem:[#allocation10_spill] sm:$0xff] %v3361_v39  ;;  %2128 = vmatpush1.bf16.msra.mxu1 %v2982_v42  ;;  %v3532_v39 = vadd.s32 104, %v3225_v59 }
  0xec   :  { %v1108_v56 = vrot.slane %v653_v55, 7  ;;  %v3375_v50 = vpop.f32.mrf.mxu1  ;;  %v2983_v55 = vld [vmem:[%s4813_s3 + $0x8] sm:$0xff]   ;;  %2129 = vmatprep.subr.bf16.mxu1 %v4822_v46 }
  0xed   :  { %v2786_v57 = vpop.f32.mrf.mxu0  ;;  %4889 = vst [vmem:[#allocation12_spill] sm:$0xff] %v3375_v50 }
  0xee   :  { %v1111_v1 = vrot.slane %v2786_v57, 7  ;;  %v3326_v2 = vsel %vm4829_vm3, %v1107_v43, %v1108_v56 }
  0xef   :  { %v656_v4 = vpop.f32.mrf.mxu0  ;;  %2130 = vmatpush1.bf16.msra.mxu1 %v2983_v55  ;;  %v78_v55 = vand.u32 15, %v30_v14  ;;  %v48_v14 = vadd.s32 160, %v3225_v59 }
  0xf0   :  { %v1109_v6 = vrot.slane %v656_v4, 7  ;;  %v3331_v10 = vsel %vm4829_vm3, %v1110_v0, %v1111_v1  ;;  %2131 = vmatprep.subr.bf16.mxu1 %v4822_v46 }
  0xf1   :  { %v2789_v12 = vpop.f32.mrf.mxu0  ;;  %vm3452_vm4 = vcmp.eq.s32.totalorder %v78_v55, 0 }
  0xf2   :  { %v3340_v15 = vsel %vm4829_vm3, %v1109_v6, %v1110_v0  ;;  %v3344_v17 = vsel %vm4829_vm3, %v1108_v56, %v1109_v6  ;;  %v1114_v28 = vrot.slane %v2789_v12, 7  ;;  %v3389_v6 = vpop.f32.mrf.mxu1 }
  0xf3   :  { %4885 = vst [vmem:[#allocation8_spill] sm:$0xff] %v3344_v17  ;;  %v669_v18 = vpop.f32.mrf.mxu0  ;;  %4892 = vst [vmem:[#allocation15_spill] sm:$0xff] %v3389_v6  ;;  %v4949_v17 = vmov 0 }
  0xf4   :  { %v1112_v20 = vrot.slane %v669_v18, 7  ;;  %v2984_v18 = vld [vmem:[%s4813_s3] sm:$0xff]  }
  0xf5   :  { %v2790_v25 = vpop.f32.mrf.mxu0  ;;  %2132 = vmatpush1.bf16.msra.mxu1 %v2984_v18 }
  0xf6   :  { %v1115_v29 = vrot.slane %v2790_v25, 7  ;;  %v3354_v31 = vsel %vm4829_vm3, %v1111_v1, %v1112_v20  ;;  %2141 = vmatprep.subr.bf16.mxu1 %v4822_v46 }
  0xf7   :  { %v672_v32 = vpop.f32.mrf.mxu0 }
  0xf8   :  { %v1113_v34 = vrot.slane %v672_v32, 7  ;;  %v3359_v38 = vsel %vm4829_vm3, %v1114_v28, %v1115_v29  ;;  %v38_v32 = vadd.s32 80, %v3225_v59 }
  0xf9   :  { %4886 = vst [vmem:[#allocation9_spill] sm:$0xff] %v3359_v38  ;;  %v2793_v40 = vpop.f32.mrf.mxu0 }
  0xfa   :  { %v3368_v43 = vsel %vm4829_vm3, %v1113_v34, %v1114_v28  ;;  %v3372_v45 = vsel %vm4829_vm3, %v1112_v20, %v1113_v34  ;;  %v1118_v56 = vrot.slane %v2793_v40, 7  ;;  %v32_v28 = vadd.s32 32, %v3225_v59 }
  0xfb   :  { %4888 = vst [vmem:[#allocation11_spill] sm:$0xff] %v3372_v45  ;;  %v685_v47 = vpop.f32.mrf.mxu0  ;;  %v40_v40 = vadd.s32 96, %v3225_v59  ;;  %v134_v19 = vand.u32 15, %v38_v32 }
  0xfc   :  { %v1116_v48 = vrot.slane %v685_v47, 7  ;;  %v42_v47 = vadd.s32 112, %v3225_v59 }
  0xfd   :  { %v2794_v52 = vpop.f32.mrf.mxu0  ;;  %v148_v9 = vand.u32 15, %v40_v40  ;;  %v54_v40 = vadd.s32 208, %v3225_v59  ;;  %vm3466_vm7 = vcmp.eq.s32.totalorder %v134_v19, 0  ;;  %v3485_v19 = vadd.s32 240, %v3225_v59 }
  0xfe   :  { %v1119_v57 = vrot.slane %v2794_v52, 7  ;;  %v3382_v62 = vsel %vm4829_vm3, %v1115_v29, %v1116_v48  ;;  %v36_v29 = vadd.s32 64, %v3225_v59  ;;  %v3412_v52 = vpop.f32.mrf.mxu1  ;;  %v162_v45 = vand.u32 15, %v42_v47 }
  0xff   :  { %4890 = vst [vmem:[#allocation13_spill] sm:$0xff] %v3382_v62  ;;  %v688_v0 = vpop.f32.mrf.mxu0  ;;  %4896 = vst [vmem:[#allocation19_spill] sm:$0xff] %v3412_v52  ;;  %vm3470_vm8 = vcmp.eq.s32.totalorder %v148_v9, 0  ;;  %v3490_v9 = vadd.s32 8, %v3225_v59  ;;  %v3524_v52 = vadd.s32 88, %v3225_v59  ;;  %v3554_v62 = vadd.s32 168, %v3225_v59 }
 0x100   :  { %v1117_v1 = vrot.slane %v688_v0, 7  ;;  %v3387_v4 = vsel %vm4829_vm3, %v1118_v56, %v1119_v57  ;;  %v44_v0 = vadd.s32 128, %v3225_v59  ;;  %v120_v23 = vand.u32 15, %v36_v29  ;;  %v2986_v29 = vld [vmem:[%s4813_s3 + $0x50] sm:$0xff]   ;;  %4925 = vst [vmem:[#allocation34_spill] sm:$0xff] %v3485_v19 }
 0x101   :  { %4891 = vst [vmem:[#allocation14_spill] sm:$0xff] %v3387_v4  ;;  %v3391_v12 = vpop.f32.mrf.mxu0  ;;  %vm3478_vm10 = vcmp.eq.s32.totalorder %v162_v45, 0  ;;  %v4927_v45 = vmov 0  ;;  %v71_v50 = vand.u32 15, %v3490_v9 }
 0x102   :  { %4893 = vst [vmem:[#allocation16_spill] sm:$0xff] %v3391_v12  ;;  %v3399_v20 = vsel %vm4829_vm3, %v1117_v1, %v1118_v56  ;;  %v3403_v25 = vsel %vm4829_vm3, %v1116_v48, %v1117_v1  ;;  %v2985_v56 = vld [vmem:[%s4813_s3 + $0x58] sm:$0xff]   ;;  %v4821_v4 = vrot.slane %v3391_v12, 7  ;;  %v176_v32 = vand.u32 15, %v44_v0 }
 0x103   :  { %4894 = vst [vmem:[#allocation17_spill] sm:$0xff] %v3399_v20  ;;  %4895 = vst [vmem:[#allocation18_spill] sm:$0xff] %v3403_v25  ;;  %v701_v34 = vpop.f32.mrf.mxu0  ;;  %v50_v25 = vadd.s32 176, %v3225_v59  ;;  %2142 = vmatpush2.bf16.msra.mxu1 %v2985_v56  ;;  %v190_v56 = vand.u32 15, %v46_v5  ;;  %v4902_v0 = vmov 0  ;;  %vm3462_vm6 = vcmp.eq.s32.totalorder %v120_v23, 0 }
 0x104   :  { %v1120_v42 = vrot.slane %v701_v34, 7  ;;  %v92_v34 = vand.u32 15, %v32_v28  ;;  %2143 = vmatprep.subr.bf16.mxu1 %v4822_v46  ;;  %v4903_v0 = vsel %vm3452_vm4, 4294967295, %v4902_v0  ;;  %v4912_v5 = vmov 0 }
 0x105   :  { %v3414_v48 = vpop.f32.mrf.mxu0  ;;  %4904 = vst [vmem:[#allocation25_spill] sm:$0xff] %v4903_v0  ;;  %v4913_v5 = vsel %vm3466_vm7, 4294967295, %v4912_v5  ;;  %v218_v55 = vand.u32 15, %v50_v25  ;;  %v232_v23 = vand.u32 15, %v52_v26  ;;  %vm3495_vm11 = vcmp.eq.s32.totalorder %v176_v32, 0 }
 0x106   :  { %v3422_v1 = vsel %vm4829_vm3, %v1119_v57, %v1120_v42  ;;  %v3429_v57 = vpop.f32.mrf.mxu1  ;;  %vm3458_vm5 = vcmp.eq.s32.totalorder %v92_v34, 0  ;;  %4914 = vst [vmem:[#allocation29_spill] sm:$0xff] %v4913_v5  ;;  %v4921_v34 = vmov 0  ;;  %v4928_v45 = vsel %vm3495_vm11, 4294967295, %v4927_v45 }
 0x107   :  { %4897 = vst [vmem:[#allocation20_spill] sm:$0xff] %v3422_v1  ;;  %v704_v18 = vpop.f32.mrf.mxu0  ;;  %4898 = vst [vmem:[#allocation21_spill] sm:$0xff] %v3429_v57  ;;  %v204_v57 = vand.u32 15, %v48_v14  ;;  %v3450_v1 = vadd.s32 224, %v3225_v59  ;;  %v4918_v14 = vmov 0  ;;  %v4922_v34 = vsel %vm3478_vm10, 4294967295, %v4921_v34  ;;  %2144 = vmatpush2.bf16.msra.mxu1 %v2986_v29 }
 0x108   :  { %v1121_v20 = vrot.slane %v704_v18, 7  ;;  %v4919_v14 = vsel %vm3474_vm9, 4294967295, %v4918_v14  ;;  %4923 = vst [vmem:[#allocation32_spill] sm:$0xff] %v4922_v34  ;;  %v3482_v46 = vpop.f32.mrf.mxu1  ;;  %4929 = vst [vmem:[#allocation36_spill] sm:$0xff] %v4928_v45  ;;  %v246_v25 = vand.u32 15, %v54_v40  ;;  %v3500_v26 = vadd.s32 24, %v3225_v59 }
 0x109   :  { %v3432_v28 = vpop.f32.mrf.mxu0  ;;  %4920 = vst [vmem:[#allocation31_spill] sm:$0xff] %v4919_v14  ;;  %4924 = vst [vmem:[#allocation33_spill] sm:$0xff] %v3482_v46  ;;  %vm3506_vm12 = vcmp.eq.s32.totalorder %v190_v56, 0  ;;  %vm3510_vm13 = vcmp.eq.s32.totalorder %v204_v57, 0  ;;  %v4935_v29 = vmov 0  ;;  %v260_v32 = vand.u32 15, %v3450_v1 }
 0x10a   :  { %4899 = vst [vmem:[#allocation22_spill] sm:$0xff] %v3432_v28  ;;  %v3442_v18 = vsel %vm4829_vm3, %v1121_v20, %v4821_v4  ;;  %v3446_v47 = vsel %vm4829_vm3, %v1120_v42, %v1121_v20  ;;  %v4906_v4 = vmov 0  ;;  %v4909_v20 = vmov 0  ;;  %v3544_v6 = vpop.f32.mrf.mxu1 }
 0x10b   :  { %4900 = vst [vmem:[#allocation23_spill] sm:$0xff] %v3442_v18  ;;  %4901 = vst [vmem:[#allocation24_spill] sm:$0xff] %v3446_v47  ;;  %v3456_v12 = vpop.f32.mrf.mxu0  ;;  %v4907_v4 = vsel %vm3458_vm5, 4294967295, %v4906_v4  ;;  %v4910_v20 = vsel %vm3462_vm6, 4294967295, %v4909_v20  ;;  %v4915_v42 = vmov 0  ;;  %v3503_v18 = vadd.s32 40, %v3225_v59 }
 0x10c   :  { %4905 = vst [vmem:[#allocation26_spill] sm:$0xff] %v3456_v12  ;;  %4908 = vst [vmem:[#allocation27_spill] sm:$0xff] %v4907_v4  ;;  %v4916_v42 = vsel %vm3470_vm8, 4294967295, %v4915_v42  ;;  %v4932_v12 = vmov 0  ;;  %v4936_v29 = vsel %vm3510_vm13, 4294967295, %v4935_v29  ;;  %v3518_v40 = vadd.s32 56, %v3225_v59 }
 0x10d   :  { %4911 = vst [vmem:[#allocation28_spill] sm:$0xff] %v4910_v20  ;;  %4917 = vst [vmem:[#allocation30_spill] sm:$0xff] %v4916_v42  ;;  %v3487_v47 = vpop.f32.mrf.mxu0  ;;  %v4933_v12 = vsel %vm3506_vm12, 4294967295, %v4932_v12  ;;  %v3521_v46 = vadd.s32 72, %v3225_v59  ;;  %vm3526_vm14 = vcmp.eq.s32.totalorder %v218_v55, 0  ;;  %v4939_v56 = vmov 0 }
 0x10e   :  { %4926 = vst [vmem:[#allocation35_spill] sm:$0xff] %v3487_v47  ;;  %4930 = vst [vmem:[#allocation37_spill] sm:$0xff] %v3503_v18  ;;  %v4931_v47 = vmov 0   ;;  %v4940_v56 = vsel %vm3526_vm14, 4294967295, %v4939_v56  ;;  %v64_v57 = vand.u32 15, %v3225_v59  ;;  %v3535_v1 = vadd.s32 120, %v3225_v59 }
 0x10f   :  { %2145 = vmatprep.subr.bf16.mxu1 %v4931_v47  ;;  %4934 = vst [vmem:[#allocation38_spill] sm:$0xff] %v4933_v12  ;;  %4937 = vst [vmem:[#allocation39_spill] sm:$0xff] %v4936_v29  ;;  %v3515_v28 = vpop.f32.mrf.mxu0  ;;  %vm3540_vm15 = vcmp.eq.s32.totalorder %v232_v23, 0  ;;  %v85_v23 = vand.u32 15, %v3500_v26  ;;  %v3562_v55 = vadd.s32 200, %v3225_v59  ;;  %v3571_v26 = vadd.s32 216, %v3225_v59 }
 0x110   :  { %4938 = vst [vmem:[#allocation40_spill] sm:$0xff] %v3515_v28  ;;  %4941 = vst [vmem:[#allocation41_spill] sm:$0xff] %v4940_v56  ;;  %v3538_v28 = vadd.s32 136, %v3225_v59  ;;  %v4944_v60 = vsel %vm3540_vm15, 4294967295, %v4943_v60  ;;  %2146 = vmatpush2.bf16.msra.mxu1 %v2987_v3  ;;  %vm3573_vm0 = vcmp.eq.s32.totalorder %v246_v25, 0  ;;  %v1229_v3 = vsel %vm3462_vm6, 0.0, %v3275_v30 }
 0x111   :  { %4945 = vst [vmem:[#allocation43_spill] sm:$0xff] %v4944_v60  ;;  %4946 = vst [vmem:[#allocation44_spill] sm:$0xff] %v3544_v6  ;;  %v3547_v38 = vpop.f32.mrf.mxu0  ;;  %v3559_v60 = vadd.s32 184, %v3225_v59  ;;  %2147 = vmatprep.subr.bf16.mxu1 %v4931_v47  ;;  %v4950_v17 = vsel %vm3573_vm0, 4294967295, %v4949_v17  ;;  %vm3588_vm1 = vcmp.eq.s32.totalorder %v64_v57, 0  ;;  %v4953_v25 = vmov 0 }
 0x112   :  { %4942 = vst [vmem:[#allocation42_spill] sm:$0xff] %v3538_v28  ;;  %4947 = vst [vmem:[#allocation45_spill] sm:$0xff] %v3547_v38  ;;  %v3586_v38 = vpop.f32.mrf.mxu1  ;;  %v4954_v25 = vsel %vm3588_vm1, 4294967295, %v4953_v25  ;;  %v3598_v18 = vadd.s32 232, %v3225_v59  ;;  %vm3600_vm3 = vcmp.eq.s32.totalorder %v260_v32, 0  ;;  %v4957_v20 = vmov 0 }
 0x113   :  { %v3565_v9 = vpop.f32.mrf.mxu0  ;;  %4951 = vst [vmem:[#allocation47_spill] sm:$0xff] %v4950_v17  ;;  %4955 = vst [vmem:[#allocation49_spill] sm:$0xff] %v4954_v25  ;;  %v4958_v20 = vsel %vm3600_vm3, 4294967295, %v4957_v20  ;;  %v1223_v30 = vsel %vm3452_vm4, 0.0, %v3243_v8  ;;  %v1231_v47 = vsel %vm3466_vm7, 0.0, %v3285_v36  ;;  %v1233_v32 = vsel %vm3470_vm8, 0.0, %v3295_v44 }
 0x114   :  { %4948 = vst [vmem:[#allocation46_spill] sm:$0xff] %v3565_v9  ;;  %v3581_v9 = vadd.s32 248, %v3225_v59  ;;  %4956 = vst [vmem:[#allocation50_spill] sm:$0xff] %v3598_v18  ;;  %v3625_v28 = vadd.f32 %v1229_v3, %v3231_v63  ;;  %v3629_v6 = vadd.f32 %v3239_v7, %v3279_v33  ;;  %v1235_v36 = vsel %vm3478_vm10, 0.0, %v3312_v53  ;;  %v3646_v7 = vpop.f32.mrf.mxu1  ;;  %v4977_v12 = vld [vmem:[#allocation19_spill] sm:$0xff]  ;;  %v4979_v45 = vld [vmem:[#allocation33_spill] sm:$0xff] }
 0x115   :  { %v3592_v19 = vpop.f32.mrf.mxu0  ;;  %4959 = vst [vmem:[#allocation51_spill] sm:$0xff] %v4958_v20  ;;  %vm3634_vm2 = vcmp.eq.s32.totalorder %v71_v50, 15  ;;  %v3641_v57 = vadd.f32 %v3289_v37, %v3251_v13  ;;  %v1237_v63 = vsel %vm3495_vm11, 0.0, %v3326_v2  ;;  %v1123_v33 = vrot.slane %v3414_v48, 7  ;;  %v4985_v5 = vld [vmem:[#allocation22_spill] sm:$0xff] }
 0x116   :  { %4952 = vst [vmem:[#allocation48_spill] sm:$0xff] %v3581_v9  ;;  %v3651_v50 = vadd.f32 %v3229_v61, %v1231_v47  ;;  %v3654_v8 = vadd.f32 %v1233_v32, %v3271_v27  ;;  %v1239_v13 = vsel %vm3506_vm12, 0.0, %v3340_v15  ;;  %v1241_v37 = vsel %vm3510_vm13, 0.0, %v3354_v31  ;;  %v4964_v31 = vld [vmem:[#allocation13_spill] sm:$0xff]  ;;  %v4995_v25 = vld [vmem:[#allocation26_spill] sm:$0xff] }
 0x117   :  { %v3621_v0 = vpop.f32.mrf.mxu0  ;;  %v3663_v2 = vadd.f32 %v3261_v21, %v1235_v36  ;;  %v3667_v48 = vadd.f32 %v3281_v35, %v3303_v49  ;;  %v3671_v61 = vadd.f32 %v3316_v54, %v3291_v41  ;;  %v1243_v27 = vsel %vm3526_vm14, 0.0, %v3368_v43  ;;  %v4963_v35 = vld [vmem:[#allocation8_spill] sm:$0xff]  ;;  %v4968_v43 = vld [vmem:[#allocation7_spill] sm:$0xff]  ;;  %v4976_v41 = vld [vmem:[#allocation10_spill] sm:$0xff] }
 0x118   :  { %v3679_v47 = vadd.f32 %v1237_v63, %v3319_v58  ;;  %v3683_v21 = vadd.f32 %v3333_v11, %v3331_v10  ;;  %v3687_v49 = vadd.f32 %v4963_v35, %v3347_v24  ;;  %v1245_v54 = vsel %vm3540_vm15, 0.0, %v4964_v31  ;;  %v4969_v58 = vld [vmem:[#allocation12_spill] sm:$0xff]  ;;  %v4970_v10 = vld [vmem:[#allocation9_spill] sm:$0xff]  ;;  %v4971_v11 = vld [vmem:[#allocation15_spill] sm:$0xff]  ;;  %v873_v24 = vpop.f32.mrf.mxu1 }
 0x119   :  { %v2837_v3 = vpop.f32.mrf.mxu0  ;;  %vm3692_vm13 = vcmp.eq.s32.totalorder %v85_v23, 15  ;;  %v3697_v36 = vadd.f32 %v4968_v43, %v1239_v13  ;;  %v3700_v63 = vadd.f32 %v1241_v37, %v4969_v58  ;;  %v3704_v53 = vadd.f32 %v4971_v11, %v4970_v10  ;;  %v4973_v35 = vld [vmem:[#allocation2_spill] sm:$0xff]  ;;  %v4978_v13 = vld [vmem:[#allocation11_spill] sm:$0xff]  ;;  %v4981_v10 = vld [vmem:[#allocation17_spill] sm:$0xff] }
 0x11a   :  { %v4974_v56 = vrot.slane %v4973_v35, 7  ;;  %vm4975_vm14 = vcmp.lt.s32.totalorder %v3225_v59, 1  ;;  %v3711_v29 = vadd.f32 %v4976_v41, %v1243_v27  ;;  %v3715_v43 = vadd.f32 %v4978_v13, %v4977_v12  ;;  %v4982_v35 = vld [vmem:[#allocation14_spill] sm:$0xff]  ;;  %v4983_v42 = vld [vmem:[#allocation44_spill] sm:$0xff]  ;;  %v4987_v13 = vld [vmem:[#allocation37_spill] sm:$0xff] }
 0x11b   :  { %v3676_v15 = vpop.f32.mrf.mxu0  ;;  %4972 = vst [vmem:[#allocation8_spill] sm:$0xff] %v3704_v53  ;;  %v1319_v37 = vrot.slane %v2837_v3, 1  ;;  %v3718_v34 = vadd.f32 %v1245_v54, %v4979_v45  ;;  %v1247_v11 = vsel %vm3573_vm0, 0.0, %v4981_v10  ;;  %v1255_v27 = vadd.f32 %v4985_v5, %v1223_v30  ;;  %v3736_v54 = vld [vmem:[%s4814_s2] ss:$0 sm:$0xff]  ;;  %v4991_v5 = vld [vmem:[#allocation20_spill] sm:$0xff] }
 0x11c   :  { %4962 = vst [vmem:[#allocation52_spill] sm:$0xff] %v3676_v15  ;;  %v1156_v31 = vsel %vm4975_vm14, %v1123_v33, %v4974_v56  ;;  %v3725_v56 = vadd.f32 %v4983_v42, %v4982_v35  ;;  %vm4986_vm14 = vcmp.lt.s32.totalorder %v3225_v59, 7  ;;  %v4988_v42 = vand.u32 15, %v4987_v13  ;;  %v4992_v35 = vld [vmem:[#allocation16_spill] sm:$0xff]  ;;  %v4996_v13 = vld [vmem:[#allocation18_spill] sm:$0xff] }
 0x11d   :  { %v2838_v23 = vpop.f32.mrf.mxu0  ;;  %4980 = vst [vmem:[#allocation13_spill] sm:$0xff] %v3718_v34  ;;  %v1221_v12 = vsel %vm3588_vm1, 0.0, %v1156_v31  ;;  %v1249_v30 = vsel %vm3600_vm3, 0.0, %v4991_v5  ;;  %v2832_v31 = vpop.f32.mrf.mxu1  ;;  %v4993_v3 = vrot.slane %v4992_v35, 7  ;;  %v4997_v18 = vld [vmem:[#allocation40_spill] sm:$0xff]  ;;  %vm4999_vm15 = vcmp.lt.s32.totalorder %v3225_v59, 7 }
 0x11e   :  { %v1320_v58 = vrot.slane %v2838_v23, 1  ;;  %4984 = vst [vmem:[#allocation7_spill] sm:$0xff] %v3725_v56  ;;  %vm3740_vm0 = vcmp.eq.s32.totalorder %v4988_v42, 15  ;;  %v1253_v56 = vadd.f32 %v1221_v12, %v4995_v25  ;;  %v3754_v42 = vadd.f32 %v4996_v13, %v3586_v38  ;;  %v4998_v53 = vld [vmem:[#allocation4_spill] sm:$0xff]  ;;  %vm5001_vm3 = vmmov %vm4999_vm15  ;;  %v2988_v25 = vld [vmem:[%s4813_s3 + $0x40] sm:$0xff]   ;;  %s2999_s3 = smov 64  }
 0x11f   :  { %v936_v41 = vpop.f32.mrf.mxu0  ;;  %v1254_v9 = vadd.f32 %v4998_v53, %v4997_v18  ;;  %v5000_v20 = vrot.slane %v3676_v15, 1  ;;  %2148 = vmatpush2.bf16.msra.mxu1 %v2988_v25  ;;  %v5010_v25 = vld [vmem:[#allocation34_spill] sm:$0xff]  ;;  %vm5022_vm11 = vmmov %vm4999_vm15  ;;  %vm5034_vm8 = vcmp.lt.s32.totalorder %v3225_v59, 7  ;;  %v5040_v14 = vand.u32 15, %v3532_v39 }
 0x120   :  { %v1378_v45 = vsel %vm4986_vm14, %v1319_v37, %v1320_v58  ;;  %v1318_v23 = vrot.slane %v936_v41, 1  ;;  %vm4994_vm14 = vcmp.lt.s32.totalorder %v3225_v59, 1  ;;  %vm5024_vm10 = vmmov %vm5022_vm11 }
 0x121   :  { %v1125_v17 = vsel %vm4994_vm14, %v4993_v3, %v1123_v33  ;;  %v1480_v34 = vadd.f32 %v1378_v45, %v1255_v27  ;;  %v2841_v41 = vpop.f32.mrf.mxu0  ;;  %v5002_v33 = vld [vmem:[#allocation21_spill] sm:$0xff]  ;;  %vm5036_vm7 = vmmov %vm5034_vm8 }
 0x122   :  { %v1379_v5 = vsel %vm4999_vm15, %v1318_v23, %v1319_v37  ;;  %v1380_v35 = vsel %vm5001_vm3, %v5000_v20, %v1318_v23  ;;  %v3768_v27 = vadd.f32 %v5002_v33, %v1247_v11  ;;  %v3773_v37 = vadd.f32 %v1249_v30, %v873_v24  ;;  %v5006_v11 = vld [vmem:[#allocation3_spill] sm:$0xff] }
 0x123   :  { %v1519_v38 = vadd.f32 %v3736_v54, %v1480_v34  ;;  %v1447_v18 = vsel %vm3634_vm2, 0.0, %v1379_v5  ;;  %v1478_v53 = vadd.f32 %v1380_v35, %v1253_v56  ;;  %v949_v12 = vpop.f32.mrf.mxu0  ;;  %v3775_v3 = vadd.f32 %v2832_v31, %v1125_v17  ;;  %v5007_v34 = vld [vmem:[#allocation35_spill] sm:$0xff] }
 0x124   :  { %v1479_v45 = vadd.f32 %v1447_v18, %v1254_v9  ;;  %v1321_v20 = vrot.slane %v949_v12, 1  ;;  %v5003_v23 = vand.u32 15, %v3518_v40  ;;  %v1256_v33 = vadd.f32 %v5007_v34, %v5006_v11  ;;  %v5009_v9 = vld [vmem:[#allocation45_spill] sm:$0xff]  ;;  %v5018_v34 = vld [vmem:[#allocation6_spill] sm:$0xff] }
 0x125   :  { %v3785_v15 = vmax.f32 %v1519_v38, 0.0  ;;  %v1323_v56 = vrot.slane %v2841_v41, 1  ;;  %v2842_v5 = vpop.f32.mrf.mxu0  ;;  %v1517_v24 = vadd.f32 %v3736_v54, %v1478_v53  ;;  %v5008_v17 = vsel %vm3474_vm9, 0.0, %v3265_v22  ;;  %v5015_v41 = vld [vmem:[#allocation46_spill] sm:$0xff]  ;;  %v5017_v12 = vld [vmem:[#allocation5_spill] sm:$0xff] }
 0x126   :  { %vm3779_vm3 = vcmp.eq.s32.totalorder %v5003_v23, 15  ;;  %v1259_v40 = vadd.f32 %v5009_v9, %v5008_v17  ;;  %v1377_v30 = vsel %vm4999_vm15, %v1320_v58, %v1321_v20  ;;  %v1324_v31 = vrot.slane %v2842_v5, 1  ;;  %vm5023_vm15 = vmmov %vm5022_vm11 }
 0x127   :  { %v1518_v35 = vadd.f32 %v3736_v54, %v1479_v45  ;;  %v5011_v18 = vand.u32 15, %v5010_v25  ;;  %v5012_v38 = vmov 0  ;;  %v5016_v53 = vsel %vm3458_vm5, 0.0, %v3255_v16  ;;  %v952_v11 = vpop.f32.mrf.mxu0 }
 0x128   :  { %v1257_v22 = vadd.f32 %v5016_v53, %v5015_v41  ;;  %v1260_v23 = vadd.f32 %v3592_v19, %v5017_v12  ;;  %v1449_v58 = vsel %vm3692_vm13, 0.0, %v1377_v30  ;;  %v3811_v45 = vmax.f32 %v1517_v24, 0.0 }
 0x129   :  { %vm3798_vm14 = vcmp.eq.s32.totalorder %v5011_v18, 0  ;;  %v1258_v5 = vadd.f32 %v5018_v34, %v3621_v0  ;;  %v1481_v17 = vadd.f32 %v1449_v58, %v1256_v33  ;;  %v1322_v9 = vrot.slane %v952_v11, 1  ;;  %v2845_v24 = vpop.f32.mrf.mxu0 }
 0x12a   :  { %v5013_v38 = vsel %vm3798_vm14, 4294967295, %v5012_v38  ;;  %v1550_v25 = vmax.f32 %v1518_v35, 0.0  ;;  %v5019_v18 = vand.u32 15, %v3521_v46  ;;  %v1374_v30 = vsel %vm5022_vm11, %v1323_v56, %v1324_v31 }
 0x12b   :  { %5014 = vst [vmem:[#allocation12_spill] sm:$0xff] %v5013_v38  ;;  %v1375_v0 = vsel %vm5023_vm15, %v1322_v9, %v1323_v56  ;;  %v1376_v46 = vsel %vm5024_vm10, %v1321_v20, %v1322_v9  ;;  %v1327_v11 = vrot.slane %v2845_v24, 1  ;;  %v965_v34 = vpop.f32.mrf.mxu0  ;;  %v1520_v53 = vadd.f32 %v3736_v54, %v1481_v17 }
 0x12c   :  { %vm3817_vm12 = vcmp.eq.s32.totalorder %v5019_v18, 15  ;;  %v2894_v35 = vpack.i.bf16 %v1550_v25, %v3811_v45  ;;  %v1451_v12 = vsel %vm3740_vm0, 0.0, %v1375_v0  ;;  %v1482_v58 = vadd.f32 %v1376_v46, %v1257_v22 }
 0x12d   :  { %v1582_v18 = vrot.slane %v1550_v25, 7  ;;  %v1483_v19 = vadd.f32 %v1451_v12, %v1258_v5  ;;  %v1325_v41 = vrot.slane %v965_v34, 1  ;;  %v1678_v56 = vrot.slane %v1550_v25, 1  ;;  %v2846_v0 = vpop.f32.mrf.mxu0 }
 0x12e   :  { %2895 = vrot.lane.b32.xlu0 %v2894_v35, %s2999_s3  ;;  %v5025_v20 = vand.u32 15, %v3524_v52  ;;  %v1484_v33 = vadd.f32 %v1374_v30, %v1259_v40  ;;  %v1521_v22 = vadd.f32 %v3736_v54, %v1482_v58  ;;  %v5028_v24 = vrot.slane %v3811_v45, 7 }
 0x12f   :  { %vm5029_vm11 = vcmp.lt.s32.totalorder %v3225_v59, 1  ;;  %v5031_v25 = vrot.slane %v3785_v15, 7  ;;  %v1373_v52 = vsel %vm5034_vm8, %v1324_v31, %v1325_v41  ;;  %v1328_v46 = vrot.slane %v2846_v0, 1  ;;  %v968_v34 = vpop.f32.mrf.mxu0  ;;  %vm5039_vm8 = vmmov %vm5036_vm7 }
 0x130   :  { %vm3838_vm10 = vcmp.eq.s32.totalorder %v5025_v20, 15  ;;  %v3847_v5 = vsel %vm5029_vm11, %v5028_v24, %v1582_v18  ;;  %vm5032_vm15 = vmmov %vm5029_vm11  ;;  %v5035_v40 = vrot.slane %v3785_v15, 1  ;;  %v5037_v35 = vrot.slane %v3811_v45, 1 }
 0x131   :  { %5030 = vst [vmem:[#allocation9_spill] sm:$0xff] %v3847_v5  ;;  %v3853_v17 = vsel %vm5032_vm15, %v1582_v18, %v5031_v25  ;;  %vm5038_vm11 = vmmov %vm5036_vm7  ;;  %v1453_v58 = vsel %vm3779_vm3, 0.0, %v1373_v52  ;;  %v3869_v20 = vmax.f32 %v1520_v53, 0.0  ;;  %v1522_v31 = vadd.f32 %v3736_v54, %v1483_v19  ;;  %v2849_v53 = vpop.f32.mrf.mxu0  ;;  %v5043_v19 = vld [vmem:[#allocation23_spill] sm:$0xff] }
 0x132   :  { %5033 = vst [vmem:[#allocation15_spill] sm:$0xff] %v3853_v17  ;;  %v1738_v30 = vsel %vm5036_vm7, %v1678_v56, %v5035_v40  ;;  %v1739_v12 = vsel %vm5038_vm11, %v5037_v35, %v1678_v56  ;;  %v1485_v0 = vadd.f32 %v1453_v58, %v1260_v23  ;;  %v1370_v24 = vsel %vm5039_vm8, %v1327_v11, %v1328_v46 }
 0x133   :  { %v1742_v18 = vsel %vm3634_vm2, 0.0, %v1738_v30  ;;  %v1326_v25 = vrot.slane %v968_v34, 1  ;;  %vm3876_vm7 = vcmp.eq.s32.totalorder %v5040_v14, 15  ;;  %v1488_v52 = vadd.f32 %v1370_v24, %v3651_v50  ;;  %vm5044_vm2 = vmmov %vm5039_vm8 }
 0x134   :  { %v1935_v40 = vpack.c.bf16 %v1742_v18, %v1739_v12  ;;  %v2899_v44 = vpack.i.bf16 %v3869_v20, %v3785_v15  ;;  %v3883_v30 = vmax.f32 %v1521_v22, 0.0  ;;  %v3885_v23 = vmax.f32 %v1522_v31, 0.0  ;;  %v876_v12 = vpop.f32.mrf.mxu1  ;;  %vm5045_vm15 = vmmov %vm5044_vm2  ;;  %v981_v31 = vpop.f32.mrf.mxu0 }
 0x135   :  { %v1251_v35 = vsel %vm3798_vm14, 0.0, %v5043_v19  ;;  %v1371_v39 = vsel %vm5044_vm2, %v1326_v25, %v1327_v11  ;;  %v1372_v14 = vsel %vm5045_vm15, %v1325_v41, %v1326_v25  ;;  %vm5046_vm11 = vcmask 523264   ;;  %vm5051_vm15 = vmmov %vm5044_vm2 }
 0x136   :  { %2680 = vmatprep.mubr.msk.bf16.mxu1 %vm5046_vm11, %v1935_v40  ;;  %v1524_v50 = vadd.f32 %v3736_v54, %v1485_v0  ;;  %v1523_v22 = vadd.f32 %v3736_v54, %v1484_v33  ;;  %v1527_v58 = vadd.f32 %v3736_v54, %v1488_v52  ;;  %v1455_v34 = vsel %vm3817_vm12, 0.0, %v1371_v39  ;;  %2900 = vrot.lane.b32.xlu0 %v2899_v44, %s2999_s3  ;;  %vm5062_vm14 = vmmov %vm5044_vm2 }
 0x137   :  { %v1486_v18 = vadd.f32 %v1372_v14, %v3625_v28  ;;  %v1487_v11 = vadd.f32 %v1455_v34, %v3641_v57  ;;  %v1331_v24 = vrot.slane %v2849_v53, 1  ;;  %v1329_v41 = vrot.slane %v981_v31, 1  ;;  %v5050_v28 = vld [vmem:[#allocation24_spill] sm:$0xff]  ;;  %v2850_v53 = vpop.f32.mrf.mxu0 }
 0x138   :  { %v2904_v25 = vpack.i.bf16 %v3885_v23, %v3883_v30  ;;  %v5047_v0 = vand.u32 15, %v3535_v1  ;;  %v3912_v40 = vadd.f32 %v3646_v7, %v1251_v35  ;;  %v3915_v52 = vadd.f32 %v5050_v28, %v876_v12 }
 0x139   :  { %v3917_v44 = vmax.f32 %v1527_v58, 0.0  ;;  %v1525_v57 = vadd.f32 %v3736_v54, %v1486_v18  ;;  %v1526_v19 = vadd.f32 %v3736_v54, %v1487_v11  ;;  %v1369_v1 = vsel %vm5044_vm2, %v1328_v46, %v1329_v41  ;;  %v984_v12 = vpop.f32.mrf.mxu0 }
 0x13a   :  { %vm3907_vm8 = vcmp.eq.s32.totalorder %v5047_v0, 15  ;;  %2905 = vrot.lane.b32.xlu1 %v2904_v25, %s2999_s3  ;;  %v1332_v39 = vrot.slane %v2850_v53, 1  ;;  %v3924_v14 = vmax.f32 %v1524_v50, 0.0  ;;  %v1457_v7 = vsel %vm3838_vm10, 0.0, %v1369_v1  ;;  %v5052_v50 = vld [vmem:[#allocation42_spill] sm:$0xff] }
 0x13b   :  { %v3929_v58 = vmax.f32 %v1523_v22, 0.0  ;;  %v3931_v34 = vmax.f32 %v1525_v57, 0.0  ;;  %v3933_v18 = vmax.f32 %v1526_v19, 0.0  ;;  %v1489_v31 = vadd.f32 %v1457_v7, %v3629_v6  ;;  %v2853_v53 = vpop.f32.mrf.mxu0 }
 0x13c   :  { %v1366_v46 = vsel %vm5051_vm15, %v1331_v24, %v1332_v39  ;;  %v1330_v11 = vrot.slane %v984_v12, 1  ;;  %v5053_v25 = vand.u32 15, %v5052_v50  ;;  %v4858_v28 = vrot.slane %v3917_v44, 1  ;;  %vm5056_vm15 = vmmov %vm5044_vm2 }
 0x13d   :  { %v1492_v22 = vadd.f32 %v1366_v46, %v3663_v2  ;;  %v2909_v57 = vpack.i.bf16 %v3924_v14, %v3929_v58  ;;  %v1680_v6 = vrot.slane %v3869_v20, 1  ;;  %v4859_v19 = vrot.slane %v3933_v18, 1 }
 0x13e   :  { %vm3940_vm11 = vcmp.eq.s32.totalorder %v5053_v25, 15  ;;  %v1367_v1 = vsel %vm5044_vm2, %v1330_v11, %v1331_v24  ;;  %v1368_v7 = vsel %vm5056_vm15, %v1329_v41, %v1330_v11  ;;  %v1335_v12 = vrot.slane %v2853_v53, 1  ;;  %v997_v25 = vpop.f32.mrf.mxu0 }
 0x13f   :  { %v1531_v50 = vadd.f32 %v3736_v54, %v1492_v22  ;;  %v1459_v2 = vsel %vm3876_vm7, 0.0, %v1367_v1  ;;  %v1490_v46 = vadd.f32 %v1368_v7, %v3654_v8  ;;  %2910 = vrot.lane.b32.xlu1 %v2909_v57, %s2999_s3  ;;  %v2914_v35 = vpack.i.bf16 %v3933_v18, %v3931_v34 }
 0x140   :  { %v3967_v24 = vsel %vm5044_vm2, %v4859_v19, %v4858_v28  ;;  %v1491_v41 = vadd.f32 %v1459_v2, %v3671_v61  ;;  %v1333_v11 = vrot.slane %v997_v25, 1  ;;  %v1528_v22 = vadd.f32 %v3736_v54, %v1489_v31  ;;  %v2854_v61 = vpop.f32.mrf.mxu0 }
 0x141   :  { %v5057_v8 = vand.u32 15, %v3551_v51  ;;  %v5058_v57 = vmov 0  ;;  %v3980_v1 = vmax.f32 %v1531_v50, 0.0  ;;  %v1529_v7 = vadd.f32 %v3736_v54, %v1490_v46  ;;  %2915 = vrot.lane.b32.xlu0 %v2914_v35, %s2999_s3 }
 0x142   :  { %v5061_v2 = vrot.slane %v3883_v30, 1  ;;  %v1530_v31 = vadd.f32 %v3736_v54, %v1491_v41  ;;  %v1365_v25 = vsel %vm5062_vm14, %v1332_v39, %v1333_v11  ;;  %v3991_v28 = vmax.f32 %v1528_v22, 0.0  ;;  %v1000_v35 = vpop.f32.mrf.mxu0  ;;  %vm5064_vm14 = vmmov %vm5044_vm2 }
 0x143   :  { %vm3973_vm15 = vcmp.eq.s32.totalorder %v5057_v8, 15  ;;  %v1336_v8 = vrot.slane %v2854_v61, 1  ;;  %v1461_v46 = vsel %vm3907_vm8, 0.0, %v1365_v25  ;;  %v3996_v53 = vmax.f32 %v1529_v7, 0.0 }
 0x144   :  { %v5059_v57 = vsel %vm3973_vm15, 4294967295, %v5058_v57  ;;  %v1736_v51 = vsel %vm5044_vm2, %v1680_v6, %v5061_v2  ;;  %v5063_v19 = vrot.slane %v3785_v15, 1  ;;  %v4002_v41 = vmax.f32 %v1530_v31, 0.0 }
 0x145   :  { %5060 = vst [vmem:[#allocation2_spill] sm:$0xff] %v5059_v57  ;;  %v1493_v39 = vadd.f32 %v1461_v46, %v3667_v48  ;;  %v1362_v22 = vsel %vm5064_vm14, %v1335_v12, %v1336_v8  ;;  %v1334_v61 = vrot.slane %v1000_v35, 1  ;;  %v5065_v50 = vand.u32 15, %v3554_v62  ;;  %vm5068_vm14 = vmmov %vm5044_vm2 }
 0x146   :  { %v1737_v2 = vsel %vm5044_vm2, %v5063_v19, %v1680_v6  ;;  %v4862_v7 = vrot.slane %v3980_v1, 1  ;;  %v1496_v38 = vadd.f32 %v1362_v22, %v3697_v36  ;;  %v2919_v6 = vpack.i.bf16 %v3991_v28, %v3917_v44  ;;  %v2857_v19 = vpop.f32.mrf.mxu0 }
 0x147   :  { %vm4009_vm6 = vcmp.eq.s32.totalorder %v5065_v50, 15  ;;  %v1744_v48 = vsel %vm3692_vm13, 0.0, %v1736_v51  ;;  %v4863_v31 = vrot.slane %v4002_v41, 1  ;;  %v1363_v62 = vsel %vm5044_vm2, %v1334_v61, %v1335_v12  ;;  %vm5069_vm13 = vmmov %vm5044_vm2 }
 0x148   :  { %v1364_v50 = vsel %vm5068_vm14, %v1333_v11, %v1334_v61  ;;  %v1339_v46 = vrot.slane %v2857_v19, 1  ;;  %v1535_v35 = vadd.f32 %v3736_v54, %v1496_v38  ;;  %v1463_v36 = vsel %vm3940_vm11, 0.0, %v1363_v62  ;;  %2920 = vrot.lane.b32.xlu1 %v2919_v6, %s2999_s3  ;;  %v1013_v32 = vpop.f32.mrf.mxu0  ;;  %vm5075_vm14 = vmmov %vm5069_vm13 }
 0x149   :  { %v1494_v22 = vadd.f32 %v1364_v50, %v3679_v47  ;;  %v2924_v51 = vpack.i.bf16 %v4002_v41, %v3996_v53  ;;  %v4037_v12 = vsel %vm5069_vm13, %v4863_v31, %v4862_v7  ;;  %v1495_v38 = vadd.f32 %v1463_v36, %v3687_v49 }
 0x14a   :  { %v1337_v11 = vrot.slane %v1013_v32, 1  ;;  %v1532_v61 = vadd.f32 %v3736_v54, %v1493_v39  ;;  %v5070_v47 = vand.u32 15, %v3559_v60  ;;  %v5071_v6 = vmov 0  ;;  %v2858_v49 = vpop.f32.mrf.mxu0 }
 0x14b   :  { %v4050_v62 = vmax.f32 %v1535_v35, 0.0  ;;  %v1533_v50 = vadd.f32 %v3736_v54, %v1494_v22  ;;  %2925 = vrot.lane.b32.xlu0 %v2924_v51, %s2999_s3  ;;  %v4054_v36 = vpack.c.bf16 %v1744_v48, %v1737_v2  ;;  %v1534_v39 = vadd.f32 %v3736_v54, %v1495_v38 }
 0x14c   :  { %vm4043_vm2 = vcmp.eq.s32.totalorder %v5070_v47, 15  ;;  %v1361_v60 = vsel %vm5075_vm14, %v1336_v8, %v1337_v11  ;;  %v1340_v32 = vrot.slane %v2858_v49, 1  ;;  %v4059_v47 = vmax.f32 %v1532_v61, 0.0  ;;  %v1016_v19 = vpop.f32.mrf.mxu0 }
 0x14d   :  { %v5072_v6 = vsel %vm4043_vm2, 4294967295, %v5071_v6  ;;  %5074 = vst [vmem:[#allocation19_spill] sm:$0xff] %v4054_v36  ;;  %v1682_v7 = vrot.slane %v3885_v23, 1  ;;  %v1465_v35 = vsel %vm3973_vm15, 0.0, %v1361_v60  ;;  %v4064_v22 = vmax.f32 %v1533_v50, 0.0  ;;  %v5098_v36 = vld [vmem:[#allocation50_spill] sm:$0xff] }
 0x14e   :  { %5073 = vst [vmem:[#allocation10_spill] sm:$0xff] %v5072_v6  ;;  %v4866_v51 = vrot.slane %v3869_v20, 7  ;;  %v4067_v2 = vmax.f32 %v1534_v39, 0.0  ;;  %v1497_v48 = vadd.f32 %v1465_v35, %v3683_v21  ;;  %v1358_v8 = vsel %vm5069_vm13, %v1339_v46, %v1340_v32  ;;  %v2861_v31 = vpop.f32.mrf.mxu0 }
 0x14f   :  { %v1338_v38 = vrot.slane %v1016_v19, 1  ;;  %v5076_v61 = vand.u32 15, %v3562_v55  ;;  %v1500_v50 = vadd.f32 %v1358_v8, %v3711_v29  ;;  %v2929_v39 = vpack.i.bf16 %v4059_v47, %v3980_v1 }
 0x150   :  { %v5079_v21 = vrot.slane %v3785_v15, 7  ;;  %vm5080_vm13 = vcmp.lt.s32.totalorder %v3225_v59, 1  ;;  %vm5082_vm9 = vcmp.lt.s32.totalorder %v3225_v59, 7  ;;  %v1343_v8 = vrot.slane %v2861_v31, 1 }
 0x151   :  { %vm4074_vm14 = vcmp.eq.s32.totalorder %v5076_v61, 15  ;;  %v1359_v35 = vsel %vm5082_vm9, %v1338_v38, %v1339_v46  ;;  %vm5083_vm5 = vmmov %vm5082_vm9  ;;  %v1539_v61 = vadd.f32 %v3736_v54, %v1500_v50  ;;  %2930 = vrot.lane.b32.xlu1 %v2929_v39, %s2999_s3  ;;  %v5084_v55 = vrot.slane %v4050_v62, 1 }
 0x152   :  { %v4088_v19 = vsel %vm5080_vm13, %v5079_v21, %v4866_v51  ;;  %v1360_v29 = vsel %vm5083_vm5, %v1337_v11, %v1338_v38  ;;  %v1467_v60 = vsel %vm4009_vm6, 0.0, %v1359_v35  ;;  %v1029_v21 = vpop.f32.mrf.mxu0  ;;  %v2934_v51 = vpack.i.bf16 %v4067_v2, %v4064_v22  ;;  %vm5090_vm13 = vmmov %vm5083_vm5 }
 0x153   :  { %5081 = vst [vmem:[#allocation11_spill] sm:$0xff] %v4088_v19  ;;  %v1498_v15 = vadd.f32 %v1360_v29, %v3700_v63  ;;  %v5085_v46 = vrot.slane %v4067_v2, 1  ;;  %v1499_v11 = vadd.f32 %v1467_v60, %v3715_v43  ;;  %v1341_v38 = vrot.slane %v1029_v21, 1  ;;  %vm5097_vm4 = vmmov %vm5090_vm13 }
 0x154   :  { %v1536_v50 = vadd.f32 %v3736_v54, %v1497_v48  ;;  %v5086_v63 = vand.u32 15, %v3571_v26  ;;  %v5087_v39 = vmov 0  ;;  %v4122_v4 = vmax.f32 %v1539_v61, 0.0  ;;  %2935 = vrot.lane.b32.xlu0 %v2934_v51, %s2999_s3  ;;  %v2862_v43 = vpop.f32.mrf.mxu0  ;;  %v5105_v61 = vld [vmem:[#allocation13_spill] sm:$0xff] }
 0x155   :  { %v4108_v31 = vsel %vm5083_vm5, %v5085_v46, %v5084_v55  ;;  %v1537_v55 = vadd.f32 %v3736_v54, %v1498_v15  ;;  %v1538_v48 = vadd.f32 %v3736_v54, %v1499_v11  ;;  %v1357_v26 = vsel %vm5090_vm13, %v1340_v32, %v1341_v38  ;;  %v5091_v46 = vld [vmem:[#allocation48_spill] sm:$0xff] }
 0x156   :  { %vm4114_vm9 = vcmp.eq.s32.totalorder %v5086_v63, 15  ;;  %v1344_v60 = vrot.slane %v2862_v43, 1  ;;  %v4129_v21 = vmax.f32 %v1536_v50, 0.0  ;;  %v5092_v63 = vand.u32 15, %v5091_v46  ;;  %v1032_v15 = vpop.f32.mrf.mxu0  ;;  %v5096_v43 = vld [vmem:[#allocation8_spill] sm:$0xff] }
 0x157   :  { %v5088_v39 = vsel %vm4114_vm9, 4294967295, %v5087_v39  ;;  %v1469_v51 = vsel %vm4043_vm2, 0.0, %v1357_v26  ;;  %v4140_v29 = vmax.f32 %v1537_v55, 0.0  ;;  %v5095_v11 = vrot.slane %v3929_v58, 1  ;;  %vm5104_vm2 = vmmov %vm5097_vm4 }
 0x158   :  { %5089 = vst [vmem:[#allocation33_spill] sm:$0xff] %v5088_v39  ;;  %vm4133_vm5 = vcmp.eq.s32.totalorder %v5092_v63, 15  ;;  %v4146_v50 = vmax.f32 %v1538_v48, 0.0  ;;  %v1501_v46 = vadd.f32 %v1469_v51, %v5096_v43  ;;  %v1354_v63 = vsel %vm5097_vm4, %v1343_v8, %v1344_v60  ;;  %v2865_v17 = vpop.f32.mrf.mxu0 }
 0x159   :  { %v1734_v32 = vsel %vm5090_vm13, %v1682_v7, %v5095_v11  ;;  %v1342_v19 = vrot.slane %v1032_v15, 1  ;;  %v1504_v26 = vadd.f32 %v1354_v63, %v3768_v27  ;;  %v2939_v55 = vpack.i.bf16 %v4129_v21, %v4050_v62  ;;  %vm5103_vm13 = vmmov %vm5097_vm4 }
 0x15a   :  { %v5099_v5 = vand.u32 15, %v5098_v36  ;;  %v5102_v48 = vrot.slane %v3883_v30, 1  ;;  %v4873_v15 = vrot.slane %v4146_v50, 1  ;;  %v1347_v63 = vrot.slane %v2865_v17, 1  ;;  %v1045_v57 = vpop.f32.mrf.mxu0 }
 0x15b   :  { %v1355_v27 = vsel %vm5097_vm4, %v1342_v19, %v1343_v8  ;;  %v1356_v43 = vsel %vm5104_vm2, %v1341_v38, %v1342_v19  ;;  %v1543_v36 = vadd.f32 %v3736_v54, %v1504_v26  ;;  %2940 = vrot.lane.b32.xlu1 %v2939_v55, %s2999_s3  ;;  %v1345_v8 = vrot.slane %v1045_v57, 1 }
 0x15c   :  { %vm4157_vm1 = vcmp.eq.s32.totalorder %v5099_v5, 15  ;;  %v1735_v51 = vsel %vm5103_vm13, %v5102_v48, %v1682_v7  ;;  %v1471_v5 = vsel %vm4074_vm14, 0.0, %v1355_v27  ;;  %v1502_v6 = vadd.f32 %v1356_v43, %v5105_v61  ;;  %v2866_v27 = vpop.f32.mrf.mxu0  ;;  %vm5107_vm13 = vmmov %vm5104_vm2 }
 0x15d   :  { %v2944_v7 = vpack.i.bf16 %v4146_v50, %v4140_v29  ;;  %v5106_v48 = vrot.slane %v4122_v4, 1  ;;  %v1503_v19 = vadd.f32 %v1471_v5, %v3754_v42  ;;  %v1540_v38 = vadd.f32 %v3736_v54, %v1501_v46 }
 0x15e   :  { %v4190_v26 = vmax.f32 %v1543_v36, 0.0  ;;  %v1541_v55 = vadd.f32 %v3736_v54, %v1502_v6  ;;  %v1746_v43 = vsel %vm3740_vm0, 0.0, %v1734_v32  ;;  %v1353_v42 = vsel %vm5107_vm13, %v1344_v60, %v1345_v8  ;;  %v1048_v6 = vpop.f32.mrf.mxu0  ;;  %v5108_v32 = vld [vmem:[#allocation7_spill] sm:$0xff]  ;;  %vm5109_vm0 = vmmov %vm5104_vm2 }
 0x15f   :  { %v4183_v17 = vsel %vm5104_vm2, %v4873_v15, %v5106_v48  ;;  %2945 = vrot.lane.b32.xlu0 %v2944_v7, %s2999_s3  ;;  %v1542_v48 = vadd.f32 %v3736_v54, %v1503_v19  ;;  %v1348_v57 = vrot.slane %v2866_v27, 1  ;;  %v4199_v46 = vmax.f32 %v1540_v38, 0.0  ;;  %v5110_v27 = vld [vmem:[#allocation52_spill] sm:$0xff]  ;;  %vm5112_vm4 = vmmov %vm5109_vm0 }
 0x160   :  { %v1685_v5 = vrot.slane %v3931_v34, 1  ;;  %v1473_v36 = vsel %vm4114_vm9, 0.0, %v1353_v42  ;;  %v4204_v61 = vmax.f32 %v1541_v55, 0.0  ;;  %v4206_v7 = vpack.c.bf16 %v1746_v43, %v1735_v51  ;;  %vm5113_vm2 = vmmov %vm5109_vm0 }
 0x161   :  { %v4208_v10 = vmax.f32 %v1542_v48, 0.0  ;;  %v1505_v19 = vadd.f32 %v1473_v36, %v5108_v32  ;;  %v1350_v60 = vsel %vm5109_vm0, %v1347_v63, %v1348_v57  ;;  %v5111_v38 = vrot.slane %v5110_v27, 1  ;;  %vm5114_vm13 = vmmov %vm5109_vm0 }
 0x162   :  { %v1508_v55 = vadd.f32 %v1350_v60, %v3912_v40  ;;  %v1346_v39 = vrot.slane %v1048_v6, 1  ;;  %v2949_v51 = vpack.i.bf16 %v4199_v46, %v4122_v4  ;;  %v4877_v43 = vrot.slane %v4190_v26, 1 }
 0x163   :  { %v1381_v15 = vsel %vm5112_vm4, %v1348_v57, %v5111_v38  ;;  %v4878_v48 = vrot.slane %v4208_v10, 1  ;;  %v2954_v32 = vpack.i.bf16 %v4208_v10, %v4204_v61  ;;  %v1544_v6 = vadd.f32 %v3736_v54, %v1505_v19 }
 0x164   :  { %v1477_v42 = vsel %vm4133_vm5, 0.0, %v1381_v15  ;;  %v1547_v57 = vadd.f32 %v3736_v54, %v1508_v55  ;;  %v1351_v15 = vsel %vm5113_vm2, %v1346_v39, %v1347_v63  ;;  %v1352_v40 = vsel %vm5114_vm13, %v1345_v8, %v1346_v39  ;;  %2950 = vrot.lane.b32.xlu1 %v2949_v51, %s2999_s3  ;;  %vm5122_vm13 = vmmov %vm5109_vm0 }
 0x165   :  { %v1509_v36 = vadd.f32 %v1477_v42, %v3775_v3  ;;  %v4240_v3 = vsel %vm5109_vm0, %v4878_v48, %v4877_v43  ;;  %v1475_v63 = vsel %vm4157_vm1, 0.0, %v1351_v15  ;;  %v1506_v27 = vadd.f32 %v1352_v40, %v3773_v37  ;;  %2955 = vrot.lane.b32.xlu0 %v2954_v32, %s2999_s3 }
 0x166   :  { %v4250_v8 = vmax.f32 %v1547_v57, 0.0  ;;  %v1507_v19 = vadd.f32 %v1475_v63, %v3915_v52  ;;  %v4253_v38 = vmax.f32 %v1544_v6, 0.0  ;;  %v5115_v51 = vrot.slane %v3885_v23, 7 }
 0x167   :  { %v1548_v60 = vadd.f32 %v3736_v54, %v1509_v36  ;;  %v1545_v55 = vadd.f32 %v3736_v54, %v1506_v27  ;;  %v5116_v37 = vrot.slane %v3883_v30, 7  ;;  %vm5117_vm4 = vcmp.lt.s32.totalorder %v3225_v59, 1 }
 0x168   :  { %v5119_v57 = vrot.slane %v3869_v20, 7  ;;  %vm5120_vm2 = vmmov %vm5117_vm4  ;;  %v1546_v15 = vadd.f32 %v3736_v54, %v1507_v19  ;;  %v2959_v40 = vpack.i.bf16 %v4253_v38, %v4190_v26  ;;  %v1689_v20 = vrot.slane %v3996_v53, 1 }
 0x169   :  { %v4255_v42 = vmax.f32 %v1548_v60, 0.0  ;;  %v4264_v36 = vsel %vm5117_vm4, %v5116_v37, %v5115_v51  ;;  %v5118_v32 = vmov %v5116_v37  ;;  %v4280_v63 = vmax.f32 %v1545_v55, 0.0  ;;  %vm5124_vm0 = vmmov %vm5120_vm2 }
 0x16a   :  { %v4272_v52 = vsel %vm5120_vm2, %v5119_v57, %v5118_v32  ;;  %v4284_v27 = vmax.f32 %v1546_v15, 0.0  ;;  %2960 = vrot.lane.b32.xlu1 %v2959_v40, %s2999_s3  ;;  %v1684_v54 = vrot.slane %v3924_v14, 1  ;;  %v1588_v19 = vrot.slane %v3924_v14, 7  ;;  %vm5126_vm4 = vmmov %vm5122_vm13 }
 0x16b   :  { %v4875_v6 = vrot.slane %v4255_v42, 1  ;;  %v2969_v60 = vpack.i.bf16 %v4255_v42, %v4250_v8  ;;  %v4876_v30 = vrot.slane %v4255_v42, 7  ;;  %v5121_v51 = vrot.slane %v3811_v45, 1  ;;  %vm5127_vm2 = vmmov %vm5126_vm4 }
 0x16c   :  { %v5123_v37 = vrot.slane %v3811_v45, 7  ;;  %v1587_v57 = vrot.slane %v3929_v58, 7  ;;  %v5125_v14 = vrot.slane %v3933_v18, 1  ;;  %v1707_v40 = vrot.slane %v4250_v8, 1 }
 0x16d   :  { %v4295_v55 = vsel %vm5122_vm13, %v4875_v6, %v5121_v51  ;;  %v1706_v45 = vrot.slane %v4284_v27, 1  ;;  %v2964_v6 = vpack.i.bf16 %v4284_v27, %v4280_v63  ;;  %vm5129_vm13 = vmmov %vm5127_vm2  ;;  %v5130_v39 = vrot.slane %v3885_v23, 7 }
 0x16e   :  { %v4303_v32 = vsel %vm5124_vm0, %v4876_v30, %v5123_v37  ;;  %v1731_v15 = vsel %vm5126_vm4, %v1685_v5, %v5125_v14  ;;  %v1732_v37 = vsel %vm5127_vm2, %v1684_v54, %v1685_v5  ;;  %v5128_v30 = vrot.slane %v3929_v58, 1  ;;  %vm5131_vm4 = vmmov %vm5124_vm0  ;;  %2970 = vrot.lane.b32.xlu1 %v2969_v60, %s2999_s3 }
 0x16f   :  { %v4325_v14 = vsel %vm5124_vm0, %v1587_v57, %v1588_v19  ;;  %v4331_v51 = vsel %vm5131_vm4, %v5130_v39, %v1587_v57  ;;  %v1693_v48 = vrot.slane %v4064_v22, 1  ;;  %v4340_v58 = vsel %vm5127_vm2, %v1706_v45, %v1707_v40  ;;  %2965 = vrot.lane.b32.xlu0 %v2964_v6, %s2999_s3 }
 0x170   :  { %v1733_v43 = vsel %vm5129_vm13, %v5128_v30, %v1684_v54  ;;  %v1748_v23 = vsel %vm3779_vm3, 0.0, %v1732_v37  ;;  %v5132_v5 = vsel %vm3817_vm12, 0.0, %v3967_v24  ;;  %v1770_v30 = vsel %vm4157_vm1, 0.0, %v4340_v58  ;;  %vm5134_vm12 = vmmov %vm5127_vm2 }
 0x171   :  { %v4350_v39 = vpack.c.bf16 %v5132_v5, %v1731_v15  ;;  %v4355_v54 = vpack.c.bf16 %v1748_v23, %v1733_v43  ;;  %v1589_v57 = vrot.slane %v3931_v34, 7  ;;  %v1590_v60 = vrot.slane %v3933_v18, 7  ;;  %vm5135_vm3 = vmmov %vm5124_vm0 }
 0x172   :  { %v1688_v6 = vrot.slane %v3991_v28, 1  ;;  %v1591_v13 = vrot.slane %v3917_v44, 7  ;;  %v1592_v16 = vrot.slane %v3991_v28, 7  ;;  %v5133_v24 = vrot.slane %v4002_v41, 1  ;;  %vm5136_vm13 = vmmov %vm5124_vm0 }
 0x173   :  { %v4368_v37 = vsel %vm5135_vm3, %v1589_v57, %v1590_v60  ;;  %v4372_v34 = vsel %vm5136_vm13, %v1588_v19, %v1589_v57  ;;  %v5137_v18 = vsel %vm3876_vm7, 0.0, %v4037_v12  ;;  %v1593_v28 = vrot.slane %v3996_v53, 7  ;;  %vm5138_vm0 = vmmov %vm5127_vm2 }
 0x174   :  { %v1727_v15 = vsel %vm5134_vm12, %v1689_v20, %v5133_v24  ;;  %v1728_v23 = vsel %vm5138_vm0, %v1688_v6, %v1689_v20  ;;  %v5139_v5 = vrot.slane %v3917_v44, 1  ;;  %vm5140_vm4 = vmmov %vm5138_vm0  ;;  %v1594_v53 = vrot.slane %v4002_v41, 7 }
 0x175   :  { %v4378_v43 = vpack.c.bf16 %v5137_v18, %v1727_v15  ;;  %vm5141_vm2 = vmmov %vm5135_vm3  ;;  %v1752_v56 = vsel %vm3838_vm10, 0.0, %v1728_v23  ;;  %v1697_v44 = vrot.slane %v4140_v29, 1  ;;  %v1595_v15 = vrot.slane %v3980_v1, 7 }
 0x176   :  { %v1729_v24 = vsel %vm5140_vm4, %v5139_v5, %v1688_v6  ;;  %v4389_v19 = vsel %vm5141_vm2, %v1591_v13, %v1592_v16  ;;  %vm5142_vm7 = vmmov %vm5141_vm2  ;;  %v1692_v6 = vrot.slane %v4059_v47, 1  ;;  %v5145_v41 = vrot.slane %v4067_v2, 1 }
 0x177   :  { %v4395_v12 = vsel %vm5142_vm7, %v1590_v60, %v1591_v13  ;;  %vm5143_vm12 = vmmov %vm5141_vm2  ;;  %v4403_v57 = vpack.c.bf16 %v1752_v56, %v1729_v24  ;;  %v1596_v60 = vrot.slane %v4059_v47, 7  ;;  %v5148_v18 = vrot.slane %v3980_v1, 1 }
 0x178   :  { %v4400_v20 = vsel %vm5143_vm12, %v1592_v16, %v1593_v28  ;;  %vm5144_vm3 = vmmov %vm5141_vm2  ;;  %v1597_v47 = vrot.slane %v4064_v22, 7  ;;  %v4437_v1 = vsel %vm5141_vm2, %v1594_v53, %v1595_v15  ;;  %v1696_v22 = vrot.slane %v4129_v21, 1 }
 0x179   :  { %v4408_v9 = vsel %vm5144_vm3, %v1593_v28, %v1594_v53  ;;  %vm5146_vm10 = vmmov %vm5138_vm0  ;;  %v1725_v23 = vsel %vm5138_vm0, %v5148_v18, %v1692_v6  ;;  %v5149_v28 = vsel %vm3940_vm11, 0.0, %v4108_v31  ;;  %v1701_v33 = vrot.slane %v4204_v61, 1 }
 0x17a   :  { %v1723_v13 = vsel %vm5146_vm10, %v1693_v48, %v5145_v41  ;;  %vm5147_vm13 = vmmov %vm5138_vm0  ;;  %v1599_v41 = vrot.slane %v4050_v62, 7  ;;  %v1600_v53 = vrot.slane %v4129_v21, 7  ;;  %v1601_v18 = vrot.slane %v4140_v29, 7 }
 0x17b   :  { %v1724_v16 = vsel %vm5147_vm13, %v1692_v6, %v1693_v48  ;;  %v4426_v5 = vpack.c.bf16 %v5149_v28, %v1723_v13  ;;  %vm5150_vm4 = vmmov %vm5141_vm2  ;;  %v1598_v48 = vrot.slane %v4067_v2, 7  ;;  %v5156_v13 = vrot.slane %v4146_v50, 1 }
 0x17c   :  { %v1756_v24 = vsel %vm3907_vm8, 0.0, %v1724_v16  ;;  %v4433_v56 = vsel %vm5150_vm4, %v1595_v15, %v1596_v60  ;;  %vm5151_vm11 = vmmov %vm5141_vm2  ;;  %v5154_v15 = vrot.slane %v4050_v62, 1  ;;  %v1602_v29 = vrot.slane %v4146_v50, 7 }
 0x17d   :  { %v4440_v0 = vpack.c.bf16 %v1756_v24, %v1725_v23  ;;  %v4444_v31 = vsel %vm5151_vm11, %v1596_v60, %v1597_v47  ;;  %vm5152_vm8 = vmmov %vm5141_vm2  ;;  %v1604_v25 = vrot.slane %v4199_v46, 7  ;;  %v1608_v49 = vrot.slane %v4253_v38, 7 }
 0x17e   :  { %v4450_v6 = vsel %vm5152_vm8, %v1597_v47, %v1598_v48  ;;  %vm5153_vm7 = vmmov %vm5138_vm0  ;;  %v5161_v47 = vsel %vm4009_vm6, 0.0, %v4183_v17  ;;  %v5183_v11 = vrot.slane %v4255_v42, 1 }
 0x17f   :  { %v1720_v2 = vsel %vm5153_vm7, %v1696_v22, %v1697_v44  ;;  %vm5155_vm12 = vmmov %vm5138_vm0 }
 0x180   :  { %v1721_v60 = vsel %vm5155_vm12, %v5154_v15, %v1696_v22  ;;  %vm5157_vm3 = vmmov %vm5138_vm0  ;;  %v1760_v28 = vsel %vm3973_vm15, 0.0, %v1720_v2  ;;  %v1705_v2 = vrot.slane %v4280_v63, 1  ;;  %v1700_v15 = vrot.slane %v4199_v46, 1 }
 0x181   :  { %v1719_v16 = vsel %vm5157_vm3, %v1697_v44, %v5156_v13  ;;  %vm5159_vm10 = vmmov %vm5141_vm2  ;;  %v4481_v44 = vpack.c.bf16 %v1760_v28, %v1721_v60  ;;  %v1606_v60 = vrot.slane %v4208_v10, 7  ;;  %v5170_v28 = vld [vmem:[#allocation10_spill] sm:$0xff] }
 0x182   :  { %v4469_v21 = vsel %vm5159_vm10, %v1599_v41, %v1600_v53  ;;  %vm5160_vm13 = vmmov %vm5141_vm2  ;;  %v4479_v24 = vpack.c.bf16 %v5161_v47, %v1719_v16  ;;  %v5166_v16 = vrot.slane %v4122_v4, 1  ;;  %vm5171_vm7 = vnez %v5170_v28 }
 0x183   :  { %v4473_v62 = vsel %vm5160_vm13, %v1598_v48, %v1599_v41  ;;  %vm5162_vm15 = vmmov %vm5141_vm2  ;;  %v1603_v48 = vrot.slane %v4122_v4, 7  ;;  %v5164_v41 = vrot.slane %v4208_v10, 1  ;;  %v5172_v10 = vsel %vm4074_vm14, 0.0, %v4240_v3 }
 0x184   :  { %v4486_v22 = vsel %vm5162_vm15, %v1600_v53, %v1601_v18  ;;  %vm5163_vm6 = vmmov %vm5141_vm2  ;;  %v1605_v53 = vrot.slane %v4204_v61, 7 }
 0x185   :  { %v4494_v17 = vsel %vm5163_vm6, %v1601_v18, %v1602_v29  ;;  %v1715_v50 = vsel %vm5138_vm0, %v1701_v33, %v5164_v41  ;;  %vm5165_vm4 = vmmov %vm5138_vm0  ;;  %v1609_v41 = vrot.slane %v4280_v63, 7 }
 0x186   :  { %v1716_v13 = vsel %vm5165_vm4, %v1700_v15, %v1701_v33  ;;  %vm5167_vm2 = vmmov %vm5138_vm0  ;;  %v4522_v33 = vpack.c.bf16 %v5172_v10, %v1715_v50 }
 0x187   :  { %v1717_v46 = vsel %vm5167_vm2, %v5166_v16, %v1700_v15  ;;  %vm5168_vm11 = vmmov %vm5163_vm6  ;;  %v1764_v61 = vsel %vm5171_vm7, 0.0, %v1716_v13  ;;  %v5177_v13 = vrot.slane %v4190_v26, 1 }
 0x188   :  { %v4510_v18 = vsel %vm5168_vm11, %v1603_v48, %v1604_v25  ;;  %vm5169_vm8 = vmmov %vm5163_vm6  ;;  %v4528_v47 = vpack.c.bf16 %v1764_v61, %v1717_v46  ;;  %v5187_v61 = vrot.slane %v4255_v42, 7 }
 0x189   :  { %v4514_v23 = vsel %vm5169_vm8, %v1602_v29, %v1603_v48  ;;  %vm5173_vm12 = vmmov %vm5163_vm6  ;;  %v1704_v29 = vrot.slane %v4253_v38, 1  ;;  %v1607_v48 = vrot.slane %v4190_v26, 7  ;;  %v1610_v26 = vrot.slane %v4284_v27, 7 }
 0x18a   :  { %v4526_v4 = vsel %vm5173_vm12, %v1605_v53, %v1606_v60  ;;  %vm5174_vm3 = vmmov %vm5163_vm6  ;;  %v5186_v27 = vsel %vm4133_vm5, 0.0, %v4295_v55  ;;  %vm5192_vm5 = vcmask 523264  }
 0x18b   :  { %v4532_v15 = vsel %vm5174_vm3, %v1604_v25, %v1605_v53  ;;  %vm5175_vm14 = vmmov %vm5138_vm0 }
 0x18c   :  { %v1711_v3 = vsel %vm5175_vm14, %v1705_v2, %v1706_v45  ;;  %vm5176_vm10 = vmmov %vm5138_vm0  ;;  %v5197_v45 = vld [vmem:[#allocation15_spill] sm:$0xff] }
 0x18d   :  { %v1712_v50 = vsel %vm5176_vm10, %v1704_v29, %v1705_v2  ;;  %vm5178_vm13 = vmmov %vm5138_vm0  ;;  %v4556_v38 = vpack.c.bf16 %v1770_v30, %v1711_v3  ;;  %v1611_v30 = vrot.slane %v4250_v8, 7  ;;  %v5193_v3 = vld [vmem:[#allocation9_spill] sm:$0xff] }
 0x18e   :  { %v1713_v25 = vsel %vm5178_vm13, %v5177_v13, %v1704_v29  ;;  %vm5179_vm15 = vmmov %vm5174_vm3  ;;  %v1768_v63 = vsel %vm4114_vm9, 0.0, %v1712_v50  ;;  %v5195_v13 = vld [vmem:[#allocation19_spill] sm:$0xff] }
 0x18f   :  { %v4550_v53 = vsel %vm5179_vm15, %v1606_v60, %v1607_v48  ;;  %vm5181_vm6 = vmmov %vm5174_vm3  ;;  %v4565_v16 = vpack.c.bf16 %v1768_v63, %v1713_v25  ;;  %v5198_v63 = vld [vmem:[#allocation25_spill] sm:$0xff] }
 0x190   :  { %v4562_v2 = vsel %vm5181_vm6, %v1607_v48, %v1608_v49  ;;  %vm5182_vm0 = vmmov %vm5174_vm3  ;;  %vm5199_vm12 = vnez %v5198_v63 }
 0x191   :  { %v4569_v60 = vsel %vm5182_vm0, %v1608_v49, %v1609_v41  ;;  %vm5184_vm1 = vmmov %vm5167_vm2  ;;  %v5190_v49 = vld [vmem:[#allocation49_spill] sm:$0xff] }
 0x192   :  { %v1709_v58 = vsel %vm5184_vm1, %v1707_v40, %v5183_v11  ;;  %vm5185_vm9 = vmmov %vm5182_vm0  ;;  %vm5191_vm11 = vnez %v5190_v49 }
 0x193   :  { %v4580_v46 = vsel %vm5185_vm9, %v1609_v41, %v1610_v26  ;;  %v4586_v28 = vpack.c.bf16 %v5186_v27, %v1709_v58  ;;  %vm5188_vm4 = vmmov %vm5182_vm0  ;;  %v1645_v35 = vsel %vm5191_vm11, 0.0, %v4303_v32  ;;  %v5201_v58 = vld [vmem:[#allocation11_spill] sm:$0xff] }
 0x194   :  { %v4592_v10 = vsel %vm5188_vm4, %v1611_v30, %v5187_v61  ;;  %vm5189_vm2 = vmmov %vm5182_vm0 }
 0x195   :  { %v4596_v40 = vsel %vm5189_vm2, %v1610_v26, %v1611_v30  ;;  %vm5194_vm8 = vmmov %vm5192_vm5  ;;  %v1647_v26 = vsel %vm5199_vm12, 0.0, %v5197_v45 }
 0x196   :  { %vm5196_vm7 = vmmov %vm5192_vm5 }
 0x197   :  { %vm5200_vm3 = vmmov %vm5192_vm5 }
 0x198   :  { %vm5202_vm14 = vmmov %vm5200_vm3 }
 0x199   :  { %vm5205_vm13 = vmmov %vm5200_vm3 }
 0x19a   :  { %vm5206_vm15 = vmmov %vm5200_vm3 }
 0x19b   :  { %vm5207_vm6 = vmmov %vm5200_vm3 }
 0x19c   :  { %vm5210_vm1 = vmmov %vm5200_vm3 }
 0x19d   :  { %vm5211_vm9 = vmmov %vm5210_vm1 }
 0x19e   :  { %vm5214_vm2 = vmmov %vm5210_vm1 }
 0x19f   :  { %vm5215_vm11 = vmmov %vm5210_vm1 }
 0x1a0   :  { %v2896_v8 = vpop.permute.xlu0 %2895  ;;  %vm5220_vm12 = vmmov %vm5210_vm1 }
 0x1a1   :  { %v2898_v29 = vunpack.i.h.bf16 %v2896_v8  ;;  %v2897_v48 = vunpack.i.l.bf16 %v2896_v8 }
 0x1a3   :  { %v1902_v55 = vsel %vm5192_vm5, %v1645_v35, %v2897_v48  ;;  %v1903_v42 = vsel %vm5194_vm8, %v5193_v3, %v2898_v29  ;;  %v5203_v29 = vld [vmem:[#allocation27_spill] sm:$0xff]  ;;  %vm5216_vm5 = vmmov %vm5210_vm1 }
 0x1a4   :  { %v1934_v41 = vpack.c.bf16 %v1903_v42, %v1902_v55  ;;  %vm5204_vm10 = vnez %v5203_v29 }
 0x1a5   :  { %v1649_v48 = vsel %vm5204_vm10, 0.0, %v4272_v52  ;;  %vm5224_vm10 = vmmov %vm5210_vm1 }
 0x1a6   :  { %2150 = vmatmul.mubr.bf16.vlgmr.msra.gmra.mxu1 %v1934_v41 }
 0x1a7   :  { %2681 = vmatprep.mubr.msk.bf16.mxu1 %vm5196_vm7, %v5195_v13  ;;  %v5208_v13 = vld [vmem:[#allocation31_spill] sm:$0xff]  ;;  %vm5219_vm7 = vmmov %vm5210_vm1 }
 0x1a8   :  { %v2901_v50 = vpop.permute.xlu0 %2900  ;;  %vm5209_vm0 = vnez %v5208_v13 }
 0x1a9   :  { %v2903_v59 = vunpack.i.h.bf16 %v2901_v50  ;;  %v2902_v25 = vunpack.i.l.bf16 %v2901_v50 }
 0x1ab   :  { %v1904_v32 = vsel %vm5200_vm3, %v1647_v26, %v2902_v25  ;;  %v1905_v30 = vsel %vm5202_vm14, %v5201_v58, %v2903_v59  ;;  %v1651_v59 = vsel %vm5209_vm0, 0.0, %v4331_v51  ;;  %v5212_v26 = vld [vmem:[#allocation28_spill] sm:$0xff]  ;;  %vm5223_vm14 = vmmov %vm5210_vm1 }
 0x1ac   :  { %v2906_v11 = vpop.permute.xlu1 %2905  ;;  %v1936_v8 = vpack.c.bf16 %v1905_v30, %v1904_v32  ;;  %vm5213_vm4 = vnez %v5212_v26  ;;  %vm5229_vm0 = vmmov %vm5210_vm1 }
 0x1ad   :  { %v2908_v27 = vunpack.i.h.bf16 %v2906_v11  ;;  %v2907_v61 = vunpack.i.l.bf16 %v2906_v11  ;;  %v1653_v11 = vsel %vm5213_vm4, 0.0, %v4372_v34  ;;  %vm5233_vm4 = vmmov %vm5229_vm0 }
 0x1ae   :  { %2158 = vmatmul.mubr.bf16.gmra.mxu1 %v1936_v8 }
 0x1af   :  { %v1906_v49 = vsel %vm5205_vm13, %v1649_v48, %v2907_v61  ;;  %v1907_v35 = vsel %vm5206_vm15, %v4264_v36, %v2908_v27  ;;  %2682 = vmatprep.mubr.msk.bf16.mxu1 %vm5207_vm6, %v4206_v7  ;;  %vm5225_vm13 = vmmov %vm5210_vm1 }
 0x1b0   :  { %v1938_v55 = vpack.c.bf16 %v1907_v35, %v1906_v49  ;;  %v5221_v35 = vld [vmem:[#allocation30_spill] sm:$0xff]  ;;  %vm5228_vm6 = vmmov %vm5210_vm1 }
 0x1b1   :  { %v2911_v3 = vpop.permute.xlu1 %2910  ;;  %vm5222_vm3 = vnez %v5221_v35 }
 0x1b2   :  { %v2913_v42 = vunpack.i.h.bf16 %v2911_v3  ;;  %v2912_v41 = vunpack.i.l.bf16 %v2911_v3 }
 0x1b3   :  { %v2916_v50 = vpop.permute.xlu0 %2915 }
 0x1b4   :  { %v2918_v25 = vunpack.i.h.bf16 %v2916_v50  ;;  %v2917_v52 = vunpack.i.l.bf16 %v2916_v50  ;;  %v1908_v45 = vsel %vm5210_vm1, %v1651_v59, %v2912_v41  ;;  %v1909_v36 = vsel %vm5211_vm9, %v4325_v14, %v2913_v42  ;;  %v5217_v14 = vld [vmem:[#allocation29_spill] sm:$0xff]  ;;  %vm5232_vm9 = vmmov %vm5229_vm0 }
 0x1b5   :  { %v1940_v63 = vpack.c.bf16 %v1909_v36, %v1908_v45  ;;  %vm5218_vm8 = vnez %v5217_v14  ;;  %v5230_v36 = vld [vmem:[#allocation36_spill] sm:$0xff] }
 0x1b6   :  { %v1910_v7 = vsel %vm5214_vm2, %v1653_v11, %v2917_v52  ;;  %v1911_v32 = vsel %vm5215_vm11, %v4368_v37, %v2918_v25  ;;  %2166 = vmatmul.mubr.bf16.gmra.mxu1 %v1938_v55  ;;  %v1655_v8 = vsel %vm5218_vm8, 0.0, %v4395_v12  ;;  %v1657_v55 = vsel %vm5222_vm3, 0.0, %v4400_v20  ;;  %vm5234_vm2 = vmmov %vm5229_vm0 }
 0x1b7   :  { %v1942_v58 = vpack.c.bf16 %v1911_v32, %v1910_v7  ;;  %2683 = vmatprep.mubr.msk.bf16.mxu1 %vm5216_vm5, %v4355_v54  ;;  %vm5231_vm1 = vnez %v5230_v36  ;;  %vm5237_vm5 = vmmov %vm5229_vm0 }
 0x1b8   :  { %vm5238_vm8 = vmmov %vm5229_vm0 }
 0x1b9   :  { %vm5242_vm3 = vmmov %vm5229_vm0 }
 0x1ba   :  { %v2921_v51 = vpop.permute.xlu1 %2920 }
 0x1bb   :  { %v2923_v30 = vunpack.i.h.bf16 %v2921_v51  ;;  %v2922_v27 = vunpack.i.l.bf16 %v2921_v51 }
 0x1bd   :  { %v2926_v61 = vpop.permute.xlu0 %2925  ;;  %v1912_v48 = vsel %vm5219_vm7, %v1655_v8, %v2922_v27  ;;  %v1913_v37 = vsel %vm5220_vm12, %v4389_v19, %v2923_v30  ;;  %v5226_v19 = vld [vmem:[#allocation32_spill] sm:$0xff]  ;;  %vm5241_vm12 = vmmov %vm5229_vm0 }
 0x1be   :  { %v2928_v29 = vunpack.i.h.bf16 %v2926_v61  ;;  %v2927_v34 = vunpack.i.l.bf16 %v2926_v61  ;;  %v1944_v49 = vpack.c.bf16 %v1913_v37, %v1912_v48  ;;  %2174 = vmatmul.mubr.bf16.gmra.mxu1 %v1940_v63  ;;  %vm5227_vm15 = vnez %v5226_v19 }
 0x1bf   :  { %2684 = vmatprep.mubr.msk.bf16.mxu1 %vm5225_vm13, %v4350_v39  ;;  %v1659_v59 = vsel %vm5227_vm15, 0.0, %v4437_v1  ;;  %v1661_v63 = vsel %vm5231_vm1, 0.0, %v4444_v31  ;;  %vm5246_vm13 = vmmov %vm5229_vm0 }
 0x1c0   :  { %v1914_v54 = vsel %vm5223_vm14, %v1657_v55, %v2927_v34  ;;  %v1915_v3 = vsel %vm5224_vm10, %v4408_v9, %v2928_v29  ;;  %vm5243_vm14 = vmmov %vm5229_vm0 }
 0x1c1   :  { %v1946_v42 = vpack.c.bf16 %v1915_v3, %v1914_v54  ;;  %v5244_v54 = vld [vmem:[#allocation41_spill] sm:$0xff]  ;;  %vm5247_vm15 = vmmov %vm5229_vm0 }
 0x1c2   :  { %vm5245_vm10 = vnez %v5244_v54  ;;  %vm5250_vm1 = vmmov %vm5229_vm0  ;;  %v2994_v54 = vld [vmem:[%s4815_s5 + $0x10] sm:$0xff]  }
 0x1c3   :  { %v2931_v12 = vpop.permute.xlu1 %2930 }
 0x1c4   :  { %v2933_v41 = vunpack.i.h.bf16 %v2931_v12  ;;  %v2932_v50 = vunpack.i.l.bf16 %v2931_v12 }
 0x1c6   :  { %v2936_v13 = vpop.permute.xlu0 %2935  ;;  %v1916_v52 = vsel %vm5228_vm6, %v1659_v59, %v2932_v50  ;;  %v1917_v9 = vsel %vm5229_vm0, %v4433_v56, %v2933_v41  ;;  %2182 = vmatmul.mubr.bf16.gmra.mxu1 %v1942_v58  ;;  %v5235_v56 = vld [vmem:[#allocation38_spill] sm:$0xff]  ;;  %v5239_v58 = vld [vmem:[#allocation39_spill] sm:$0xff] }
 0x1c7   :  { %v2938_v25 = vunpack.i.h.bf16 %v2936_v13  ;;  %v2937_v20 = vunpack.i.l.bf16 %v2936_v13  ;;  %v1948_v45 = vpack.c.bf16 %v1917_v9, %v1916_v52  ;;  %2685 = vmatprep.mubr.msk.bf16.mxu1 %vm5234_vm2, %v4403_v57  ;;  %vm5236_vm11 = vnez %v5235_v56  ;;  %vm5254_vm2 = vmmov %vm5229_vm0 }
 0x1c8   :  { %v1663_v30 = vsel %vm5236_vm11, 0.0, %v4473_v62  ;;  %vm5240_vm7 = vnez %v5239_v58  ;;  %vm5255_vm11 = vmmov %vm5229_vm0  ;;  %v2993_v58 = vld [vmem:[%s4815_s5 + $0x18] sm:$0xff]  }
 0x1c9   :  { %v1918_v39 = vsel %vm5232_vm9, %v1661_v63, %v2937_v20  ;;  %v1919_v26 = vsel %vm5233_vm4, %v4450_v6, %v2938_v25  ;;  %v1665_v8 = vsel %vm5240_vm7, 0.0, %v4486_v22  ;;  %v1667_v22 = vsel %vm5245_vm10, 0.0, %v4514_v23  ;;  %vm5251_vm9 = vmmov %vm5229_vm0 }
 0x1ca   :  { %v1950_v11 = vpack.c.bf16 %v1919_v26, %v1918_v39  ;;  %vm5260_vm7 = vmmov %vm5229_vm0 }
 0x1cb   :  { %vm5264_vm10 = vmmov %vm5229_vm0 }
 0x1cd   :  { %v2941_v1 = vpop.permute.xlu1 %2940 }
 0x1ce   :  { %v2943_v7 = vunpack.i.h.bf16 %v2941_v1  ;;  %v2942_v32 = vunpack.i.l.bf16 %v2941_v1  ;;  %2190 = vmatmul.mubr.bf16.gmra.mxu1 %v1944_v49  ;;  %v5248_v49 = vld [vmem:[#allocation43_spill] sm:$0xff]  ;;  %v5258_v1 = vld [vmem:[#allocation12_spill] sm:$0xff] }
 0x1cf   :  { %2686 = vmatprep.mubr.msk.bf16.mxu1 %vm5243_vm14, %v4378_v43  ;;  %vm5249_vm6 = vnez %v5248_v49  ;;  %vm5263_vm14 = vmmov %vm5229_vm0  ;;  %v2995_v49 = vld [vmem:[%s4815_s5 + $0x8] sm:$0xff]  }
 0x1d0   :  { %v1920_v61 = vsel %vm5237_vm5, %v1663_v30, %v2942_v32  ;;  %v1921_v6 = vsel %vm5238_vm8, %v4469_v21, %v2943_v7  ;;  %v1669_v12 = vsel %vm5249_vm6, 0.0, %v4532_v15  ;;  %vm5259_vm8 = vnez %v5258_v1  ;;  %vm5267_vm6 = vmmov %vm5229_vm0 }
 0x1d1   :  { %v2946_v51 = vpop.permute.xlu0 %2945  ;;  %v1952_v14 = vpack.c.bf16 %v1921_v6, %v1920_v61 }
 0x1d2   :  { %v2948_v27 = vunpack.i.h.bf16 %v2946_v51  ;;  %v2947_v31 = vunpack.i.l.bf16 %v2946_v51 }
 0x1d4   :  { %v1922_v57 = vsel %vm5241_vm12, %v1665_v8, %v2947_v31  ;;  %v1923_v29 = vsel %vm5242_vm3, %v4494_v17, %v2948_v27  ;;  %vm5261_vm12 = vmmov %vm5229_vm0 }
 0x1d5   :  { %v1954_v34 = vpack.c.bf16 %v1923_v29, %v1922_v57  ;;  %vm5262_vm3 = vmmov %vm5229_vm0 }
 0x1d6   :  { %v2951_v62 = vpop.permute.xlu1 %2950  ;;  %2198 = vmatmul.mubr.bf16.gmra.mxu1 %v1946_v42  ;;  %v5256_v42 = vld [vmem:[#allocation51_spill] sm:$0xff] }
 0x1d7   :  { %v2953_v48 = vunpack.i.h.bf16 %v2951_v62  ;;  %v2952_v37 = vunpack.i.l.bf16 %v2951_v62  ;;  %v2956_v35 = vpop.permute.xlu0 %2955  ;;  %2687 = vmatprep.mubr.msk.bf16.mxu1 %vm5251_vm9, %v4440_v0  ;;  %vm5257_vm5 = vnez %v5256_v42  ;;  %vm5269_vm9 = vmmov %vm5229_vm0 }
 0x1d8   :  { %v2958_v21 = vunpack.i.h.bf16 %v2956_v35  ;;  %v2957_v55 = vunpack.i.l.bf16 %v2956_v35  ;;  %v1673_v0 = vsel %vm5257_vm5, 0.0, %v4569_v60  ;;  %vm2495_vm5 = vcmask 1042434  }
 0x1d9   :  { %v1924_v3 = vsel %vm5246_vm13, %v1667_v22, %v2952_v37  ;;  %v1925_v17 = vsel %vm5247_vm15, %v4510_v18, %v2953_v48  ;;  %v5252_v18 = vld [vmem:[#allocation47_spill] sm:$0xff]  ;;  %vm5265_vm13 = vmmov %vm5229_vm0 }
 0x1da   :  { %v1956_v41 = vpack.c.bf16 %v1925_v17, %v1924_v3  ;;  %v1926_v43 = vsel %vm5229_vm0, %v1669_v12, %v2957_v55  ;;  %v1927_v50 = vsel %vm5250_vm1, %v4526_v4, %v2958_v21  ;;  %vm5253_vm4 = vnez %v5252_v18  ;;  %vm5266_vm15 = vmmov %vm5229_vm0  ;;  %v2996_v18 = vld [vmem:[%s4815_s5] sm:$0xff]  }
 0x1db   :  { %v1958_v13 = vpack.c.bf16 %v1927_v50, %v1926_v43  ;;  %v1671_v23 = vsel %vm5253_vm4, 0.0, %v4550_v53  ;;  %v1675_v53 = vsel %vm5259_vm8, 0.0, %v4596_v40  ;;  %vm5268_vm1 = vmmov %vm5229_vm0  ;;  %vm2497_vm8 = vcmask 1043459  }
 0x1dc   :  { %v2961_v19 = vpop.permute.xlu1 %2960  ;;  %vm5270_vm4 = vmmov %vm5229_vm0 }
 0x1dd   :  { %v2963_v59 = vunpack.i.h.bf16 %v2961_v19  ;;  %v2962_v25 = vunpack.i.l.bf16 %v2961_v19 }
 0x1de   :  { %2206 = vmatmul.mubr.bf16.gmra.mxu1 %v1948_v45 }
 0x1df   :  { %v1928_v15 = vsel %vm5254_vm2, %v1671_v23, %v2962_v25  ;;  %v1929_v20 = vsel %vm5255_vm11, %v4562_v2, %v2963_v59  ;;  %2688 = vmatprep.mubr.msk.bf16.mxu1 %vm5264_vm10, %v4426_v5  ;;  %v3000_v5 = vmov 0.0   ;;  %vm3001_vm2 = vmmov 0  }
 0x1e0   :  { %v2971_v52 = vpop.permute.xlu1 %2970  ;;  %v1960_v4 = vpack.c.bf16 %v1929_v20, %v1928_v15  ;;  %2867 = vmatprep.subr.bf16.mxu0 %v3000_v5  ;;  %2883 = vmatprep.mubr.msk.bf16.mxu0 %vm3001_vm2, %v3000_v5  ;;  %vm2493_vm11 = vcmask 1041409  }
 0x1e1   :  { %v2966_v9 = vpop.permute.xlu0 %2965  ;;  %v2973_v36 = vunpack.i.h.bf16 %v2971_v52  ;;  %v2972_v63 = vunpack.i.l.bf16 %v2971_v52 }
 0x1e2   :  { %v2968_v39 = vunpack.i.h.bf16 %v2966_v9  ;;  %v2967_v26 = vunpack.i.l.bf16 %v2966_v9 }
 0x1e3   :  { %v1932_v32 = vsel %vm5262_vm3, %v1675_v53, %v2972_v63  ;;  %v1933_v51 = vsel %vm5263_vm14, %v4592_v10, %v2973_v36  ;;  %vm2503_vm3 = vcmask 1046534   ;;  %vm2505_vm14 = vcmask 1047559  }
 0x1e4   :  { %v1930_v7 = vsel %vm5260_vm7, %v1673_v0, %v2967_v26  ;;  %v1931_v2 = vsel %vm5261_vm12, %v4580_v46, %v2968_v39  ;;  %v1964_v30 = vpack.c.bf16 %v1933_v51, %v1932_v32  ;;  %v2992_v46 = vld [vmem:[%s4815_s5 + $0x20] sm:$0xff]   ;;  %vm2499_vm7 = vcmask 1044484  }
 0x1e5   :  { %v1962_v56 = vpack.c.bf16 %v1931_v2, %v1930_v7  ;;  %vm2501_vm12 = vcmask 1045509  }
 0x1e6   :  { %2214 = vmatmul.mubr.bf16.gmra.mxu1 %v1950_v11 }
 0x1e7   :  { %2689 = vmatprep.mubr.msk.bf16.mxu1 %vm5265_vm13, %v4481_v44  ;;  %v2990_v44 = vld [vmem:[%s4815_s5 + $0x30] sm:$0xff]  }
 0x1ee   :  { %2222 = vmatmul.mubr.bf16.gmra.mxu1 %v1952_v14 }
 0x1ef   :  { %2690 = vmatprep.mubr.msk.bf16.mxu1 %vm5266_vm15, %v4479_v24  ;;  %v2989_v24 = vld [vmem:[%s4815_s5 + $0x38] sm:$0xff]  }
 0x1f0   :  { %2868 = vmatpush3.bf16.msra.mxu0 %v2989_v24 }
 0x1f1   :  { %2869 = vmatprep.subr.bf16.mxu0 %v3000_v5 }
 0x1f4   :  { %2870 = vmatpush3.bf16.msra.mxu0 %v2990_v44 }
 0x1f5   :  { %2871 = vmatprep.subr.bf16.mxu0 %v3000_v5 }
 0x1f6   :  { %2230 = vmatmul.mubr.bf16.gmra.mxu1 %v1954_v34 }
 0x1f7   :  { %2691 = vmatprep.mubr.msk.bf16.mxu1 %vm5267_vm6, %v4528_v47  ;;  %v4736_v47 = vld [vmem:[%s4816_s4] ss:$0 sm:$0xff] }
 0x1fe   :  { %2238 = vmatmul.mubr.bf16.gmra.mxu1 %v1956_v41 }
 0x1ff   :  { %2692 = vmatprep.mubr.msk.bf16.mxu1 %vm5229_vm0, %v4522_v33  ;;  %v2991_v33 = vld [vmem:[%s4815_s5 + $0x28] sm:$0xff]  }
 0x200   :  { %2872 = vmatpush3.bf16.msra.mxu0 %v2991_v33 }
 0x201   :  { %2873 = vmatprep.subr.bf16.mxu0 %v3000_v5 }
 0x204   :  { %2874 = vmatpush3.bf16.msra.mxu0 %v2992_v46 }
 0x205   :  { %2875 = vmatprep.subr.bf16.mxu0 %v3000_v5 }
 0x206   :  { %2246 = vmatmul.mubr.bf16.gmra.mxu1 %v1958_v13 }
 0x207   :  { %2693 = vmatprep.mubr.msk.bf16.mxu1 %vm5268_vm1, %v4565_v16 }
 0x208   :  { %2876 = vmatpush3.bf16.msra.mxu0 %v2993_v58 }
 0x209   :  { %2877 = vmatprep.subr.bf16.mxu0 %v3000_v5 }
 0x20c   :  { %2878 = vmatpush3.bf16.msra.mxu0 %v2994_v54 }
 0x20d   :  { %2879 = vmatprep.subr.bf16.mxu0 %v3000_v5 }
 0x20e   :  { %2254 = vmatmul.mubr.bf16.gmra.mxu1 %v1960_v4 }
 0x20f   :  { %2694 = vmatprep.mubr.msk.bf16.mxu1 %vm5269_vm9, %v4556_v38 }
 0x210   :  { %2880 = vmatpush3.bf16.msra.mxu0 %v2995_v49 }
 0x211   :  { %2881 = vmatprep.subr.bf16.mxu0 %v3000_v5 }
 0x214   :  { %2882 = vmatpush3.bf16.msra.mxu0 %v2996_v18 }
 0x216   :  { %2262 = vmatmul.mubr.bf16.gmra.mxu1 %v1962_v56 }
 0x217   :  { %2695 = vmatprep.mubr.msk.bf16.mxu1 %vm5270_vm4, %v4586_v28 }
 0x21e   :  { %2270 = vmatmul.mubr.bf16.gmra.mxu1 %v1964_v30 }
 0x266   :  { %v2151_v38 = vpop.f32.mrf.mxu1 }
 0x267   :  { %v2152_v60 = vadd.f32 %v4736_v47, %v2151_v38 }
 0x268   :  { %v2153_v16 = vpop.f32.mrf.mxu1 }
 0x269   :  { %v2278_v45 = vmax.f32 %v2152_v60, 0.0 }
 0x26a   :  { %v2154_v28 = vpop.f32.mrf.mxu1 }
 0x26b   :  { %v2155_v10 = vadd.f32 %v4736_v47, %v2154_v28 }
 0x26c   :  { %v2156_v40 = vpop.f32.mrf.mxu1 }
 0x26d   :  { %v2279_v11 = vmax.f32 %v2155_v10, 0.0 }
 0x26e   :  { %v2159_v27 = vpop.f32.mrf.mxu1 }
 0x26f   :  { %v2310_v31 = vmax.f32 %v2278_v45, %v2279_v11  ;;  %v2160_v14 = vadd.f32 %v4736_v47, %v2159_v27 }
 0x270   :  { %v2161_v61 = vpop.f32.mrf.mxu1 }
 0x271   :  { %v2311_v6 = vrot.slane %v2310_v31, 4  ;;  %v2280_v48 = vmax.f32 %v2160_v14, 0.0 }
 0x272   :  { %v2162_v8 = vpop.f32.mrf.mxu1 }
 0x273   :  { %v2312_v57 = vmax.f32 %v2310_v31, %v2311_v6  ;;  %v2163_v29 = vadd.f32 %v4736_v47, %v2162_v8 }
 0x274   :  { %v2164_v34 = vpop.f32.mrf.mxu1 }
 0x275   :  { %v2313_v62 = vrot.slane %v2312_v57, 2  ;;  %v2281_v37 = vmax.f32 %v2163_v29, 0.0 }
 0x276   :  { %v2167_v35 = vpop.f32.mrf.mxu1 }
 0x277   :  { %v2314_v21 = vmax.f32 %v2312_v57, %v2313_v62  ;;  %v2317_v55 = vmax.f32 %v2280_v48, %v2281_v37  ;;  %v2168_v17 = vadd.f32 %v4736_v47, %v2167_v35 }
 0x278   :  { %v2169_v22 = vpop.f32.mrf.mxu1 }
 0x279   :  { %v2318_v3 = vrot.slane %v2317_v55, 4  ;;  %v2315_v41 = vrot.slane %v2314_v21, 1  ;;  %v2282_v59 = vmax.f32 %v2168_v17, 0.0 }
 0x27a   :  { %v2170_v12 = vpop.f32.mrf.mxu1 }
 0x27b   :  { %v2319_v43 = vmax.f32 %v2317_v55, %v2318_v3  ;;  %v2171_v50 = vadd.f32 %v4736_v47, %v2170_v12  ;;  %v2316_v15 = vmax.f32 %v2314_v21, %v2315_v41 }
 0x27c   :  { %v2172_v13 = vpop.f32.mrf.mxu1 }
 0x27d   :  { %v2320_v19 = vrot.slane %v2319_v43, 2  ;;  %v2283_v25 = vmax.f32 %v2171_v50, 0.0  ;;  %v2422_v26 = vpack.c.bf16 %v2316_v15, %v2316_v15 }
 0x27e   :  { %v2175_v23 = vpop.f32.mrf.mxu1 }
 0x27f   :  { %v2321_v20 = vmax.f32 %v2319_v43, %v2320_v19  ;;  %v2324_v52 = vmax.f32 %v2282_v59, %v2283_v25  ;;  %v2176_v63 = vadd.f32 %v4736_v47, %v2175_v23  ;;  %v2477_v30 = vunpack.c.l.b16 %v2422_v26 }
 0x280   :  { %v2177_v9 = vpop.f32.mrf.mxu1 }
 0x281   :  { %v2322_v4 = vrot.slane %v2321_v20, 1  ;;  %v2325_v36 = vrot.slane %v2324_v52, 4  ;;  %v2284_v32 = vmax.f32 %v2176_v63, 0.0 }
 0x282   :  { %v2178_v39 = vpop.f32.mrf.mxu1 }
 0x283   :  { %v2323_v42 = vmax.f32 %v2321_v20, %v2322_v4  ;;  %v2326_v0 = vmax.f32 %v2324_v52, %v2325_v36  ;;  %v2179_v1 = vadd.f32 %v4736_v47, %v2178_v39 }
 0x284   :  { %v2180_v53 = vpop.f32.mrf.mxu1 }
 0x285   :  { %v2423_v7 = vpack.c.bf16 %v2323_v42, %v2323_v42  ;;  %v2327_v2 = vrot.slane %v2326_v0, 2  ;;  %v2285_v51 = vmax.f32 %v2179_v1, 0.0 }
 0x286   :  { %v2183_v56 = vpop.f32.mrf.mxu1 }
 0x287   :  { %v2478_v5 = vunpack.c.l.b16 %v2423_v7  ;;  %v2328_v24 = vmax.f32 %v2326_v0, %v2327_v2  ;;  %v2331_v44 = vmax.f32 %v2284_v32, %v2285_v51  ;;  %v2184_v46 = vadd.f32 %v4736_v47, %v2183_v56 }
 0x288   :  { %v2185_v33 = vpop.f32.mrf.mxu1 }
 0x289   :  { %v2494_v38 = vsel %vm2493_vm11, %v2478_v5, %v2477_v30  ;;  %v2329_v16 = vrot.slane %v2328_v24, 1  ;;  %v2332_v60 = vrot.slane %v2331_v44, 4  ;;  %v2286_v61 = vmax.f32 %v2184_v46, 0.0 }
 0x28a   :  { %v2186_v28 = vpop.f32.mrf.mxu1 }
 0x28b   :  { %v2330_v10 = vmax.f32 %v2328_v24, %v2329_v16  ;;  %v2333_v40 = vmax.f32 %v2331_v44, %v2332_v60  ;;  %v2187_v45 = vadd.f32 %v4736_v47, %v2186_v28 }
 0x28c   :  { %v2188_v11 = vpop.f32.mrf.mxu1 }
 0x28d   :  { %v2424_v27 = vpack.c.bf16 %v2330_v10, %v2330_v10  ;;  %v2334_v31 = vrot.slane %v2333_v40, 2  ;;  %v2287_v6 = vmax.f32 %v2187_v45, 0.0 }
 0x28e   :  { %v2191_v14 = vpop.f32.mrf.mxu1 }
 0x28f   :  { %v2479_v58 = vunpack.c.l.b16 %v2424_v27  ;;  %v2335_v8 = vmax.f32 %v2333_v40, %v2334_v31  ;;  %v2338_v57 = vmax.f32 %v2286_v61, %v2287_v6  ;;  %v2192_v37 = vadd.f32 %v4736_v47, %v2191_v14 }
 0x290   :  { %v2193_v29 = vpop.f32.mrf.mxu1 }
 0x291   :  { %v2496_v34 = vsel %vm2495_vm5, %v2479_v58, %v2494_v38  ;;  %v2336_v62 = vrot.slane %v2335_v8, 1  ;;  %v2339_v48 = vrot.slane %v2338_v57, 4  ;;  %v2288_v49 = vmax.f32 %v2192_v37, 0.0 }
 0x292   :  { %v2194_v35 = vpop.f32.mrf.mxu1 }
 0x293   :  { %v2337_v21 = vmax.f32 %v2335_v8, %v2336_v62  ;;  %v2340_v55 = vmax.f32 %v2338_v57, %v2339_v48  ;;  %v2195_v54 = vadd.f32 %v4736_v47, %v2194_v35 }
 0x294   :  { %v2196_v22 = vpop.f32.mrf.mxu1 }
 0x295   :  { %v2425_v3 = vpack.c.bf16 %v2337_v21, %v2337_v21  ;;  %v2341_v17 = vrot.slane %v2340_v55, 2  ;;  %v2289_v12 = vmax.f32 %v2195_v54, 0.0 }
 0x296   :  { %v2199_v41 = vpop.f32.mrf.mxu1 }
 0x297   :  { %v2480_v43 = vunpack.c.l.b16 %v2425_v3  ;;  %v2342_v50 = vmax.f32 %v2340_v55, %v2341_v17  ;;  %v2345_v13 = vmax.f32 %v2288_v49, %v2289_v12  ;;  %v2200_v23 = vadd.f32 %v4736_v47, %v2199_v41 }
 0x298   :  { %v2201_v19 = vpop.f32.mrf.mxu1 }
 0x299   :  { %v2498_v59 = vsel %vm2497_vm8, %v2480_v43, %v2496_v34  ;;  %v2343_v25 = vrot.slane %v2342_v50, 1  ;;  %v2346_v18 = vrot.slane %v2345_v13, 4  ;;  %v2290_v39 = vmax.f32 %v2200_v23, 0.0 }
 0x29a   :  { %v2202_v15 = vpop.f32.mrf.mxu1 }
 0x29b   :  { %v2344_v20 = vmax.f32 %v2342_v50, %v2343_v25  ;;  %v2347_v52 = vmax.f32 %v2345_v13, %v2346_v18  ;;  %v2203_v9 = vadd.f32 %v4736_v47, %v2202_v15 }
 0x29c   :  { %v2204_v4 = vpop.f32.mrf.mxu1 }
 0x29d   :  { %v2426_v36 = vpack.c.bf16 %v2344_v20, %v2344_v20  ;;  %v2348_v63 = vrot.slane %v2347_v52, 2  ;;  %v2291_v26 = vmax.f32 %v2203_v9, 0.0 }
 0x29e   :  { %v2207_v42 = vpop.f32.mrf.mxu1 }
 0x29f   :  { %v2481_v0 = vunpack.c.l.b16 %v2426_v36  ;;  %v2349_v1 = vmax.f32 %v2347_v52, %v2348_v63  ;;  %v2352_v53 = vmax.f32 %v2290_v39, %v2291_v26  ;;  %v2208_v56 = vadd.f32 %v4736_v47, %v2207_v42 }
 0x2a0   :  { %v2209_v7 = vpop.f32.mrf.mxu1 }
 0x2a1   :  { %v2500_v2 = vsel %vm2499_vm7, %v2481_v0, %v2498_v59  ;;  %v2350_v32 = vrot.slane %v2349_v1, 1  ;;  %v2353_v51 = vrot.slane %v2352_v53, 4  ;;  %v2292_v60 = vmax.f32 %v2208_v56, 0.0 }
 0x2a2   :  { %v2210_v30 = vpop.f32.mrf.mxu1 }
 0x2a3   :  { %v2351_v5 = vmax.f32 %v2349_v1, %v2350_v32  ;;  %v2354_v24 = vmax.f32 %v2352_v53, %v2353_v51  ;;  %v2211_v44 = vadd.f32 %v4736_v47, %v2210_v30 }
 0x2a4   :  { %v2212_v33 = vpop.f32.mrf.mxu1 }
 0x2a5   :  { %v2427_v38 = vpack.c.bf16 %v2351_v5, %v2351_v5  ;;  %v2355_v16 = vrot.slane %v2354_v24, 2  ;;  %v2293_v46 = vmax.f32 %v2211_v44, 0.0 }
 0x2a6   :  { %v2215_v28 = vpop.f32.mrf.mxu1 }
 0x2a7   :  { %v2482_v10 = vunpack.c.l.b16 %v2427_v38  ;;  %v2356_v40 = vmax.f32 %v2354_v24, %v2355_v16  ;;  %v2359_v45 = vmax.f32 %v2292_v60, %v2293_v46  ;;  %v2216_v36 = vadd.f32 %v4736_v47, %v2215_v28 }
 0x2a8   :  { %v2217_v11 = vpop.f32.mrf.mxu1 }
 0x2a9   :  { %v2502_v27 = vsel %vm2501_vm12, %v2482_v10, %v2500_v2  ;;  %v2357_v31 = vrot.slane %v2356_v40, 1  ;;  %v2360_v61 = vrot.slane %v2359_v45, 4  ;;  %v2294_v56 = vmax.f32 %v2216_v36, 0.0 }
 0x2aa   :  { %v2218_v6 = vpop.f32.mrf.mxu1 }
 0x2ab   :  { %v2358_v14 = vmax.f32 %v2356_v40, %v2357_v31  ;;  %v2361_v58 = vmax.f32 %v2359_v45, %v2360_v61  ;;  %v2219_v15 = vadd.f32 %v4736_v47, %v2218_v6 }
 0x2ac   :  { %v2220_v8 = vpop.f32.mrf.mxu1 }
 0x2ad   :  { %v2428_v57 = vpack.c.bf16 %v2358_v14, %v2358_v14  ;;  %v2362_v29 = vrot.slane %v2361_v58, 2  ;;  %v2295_v1 = vmax.f32 %v2219_v15, 0.0 }
 0x2ae   :  { %v2223_v34 = vpop.f32.mrf.mxu1 }
 0x2af   :  { %v2483_v62 = vunpack.c.l.b16 %v2428_v57  ;;  %v2363_v48 = vmax.f32 %v2361_v58, %v2362_v29  ;;  %v2224_v9 = vadd.f32 %v4736_v47, %v2223_v34  ;;  %v2366_v38 = vmax.f32 %v2294_v56, %v2295_v1 }
 0x2b0   :  { %v2225_v37 = vpop.f32.mrf.mxu1 }
 0x2b1   :  { %v2504_v35 = vsel %vm2503_vm3, %v2483_v62, %v2502_v27  ;;  %v2364_v21 = vrot.slane %v2363_v48, 1  ;;  %v2296_v32 = vmax.f32 %v2224_v9, 0.0  ;;  %v2367_v31 = vrot.slane %v2366_v38, 4 }
 0x2b2   :  { %v2226_v55 = vpop.f32.mrf.mxu1 }
 0x2b3   :  { %v2365_v54 = vmax.f32 %v2363_v48, %v2364_v21  ;;  %v2227_v23 = vadd.f32 %v4736_v47, %v2226_v55  ;;  %v2368_v48 = vmax.f32 %v2366_v38, %v2367_v31 }
 0x2b4   :  { %v2228_v22 = vpop.f32.mrf.mxu1 }
 0x2b5   :  { %v2429_v3 = vpack.c.bf16 %v2365_v54, %v2365_v54  ;;  %v2297_v26 = vmax.f32 %v2227_v23, 0.0 }
 0x2b6   :  { %v2231_v17 = vpop.f32.mrf.mxu1 }
 0x2b7   :  { %v2484_v49 = vunpack.c.l.b16 %v2429_v3  ;;  %v2232_v63 = vadd.f32 %v4736_v47, %v2231_v17  ;;  %v2373_v44 = vmax.f32 %v2296_v32, %v2297_v26 }
 0x2b8   :  { %v2233_v12 = vpop.f32.mrf.mxu1 }
 0x2b9   :  { %v4776_v41 = vsel %vm2505_vm14, %v2484_v49, %v2504_v35  ;;  %v2298_v30 = vmax.f32 %v2232_v63, 0.0  ;;  %v2374_v11 = vrot.slane %v2373_v44, 4 }
 0x2ba   :  { %v2234_v43 = vpop.f32.mrf.mxu1 }
 0x2bb   :  { %v2235_v20 = vadd.f32 %v4736_v47, %v2234_v43  ;;  %v2375_v34 = vmax.f32 %v2373_v44, %v2374_v11  ;;  %v2369_v43 = vrot.slane %v2368_v48, 2 }
 0x2bc   :  { %v2236_v50 = vpop.f32.mrf.mxu1 }
 0x2bd   :  { %v2299_v53 = vmax.f32 %v2235_v20, 0.0  ;;  %v2376_v17 = vrot.slane %v2375_v34, 2  ;;  %v2370_v9 = vmax.f32 %v2368_v48, %v2369_v43 }
 0x2be   :  { %v2239_v13 = vpop.f32.mrf.mxu1 }
 0x2bf   :  { %v2240_v42 = vadd.f32 %v4736_v47, %v2239_v13  ;;  %v2380_v16 = vmax.f32 %v2298_v30, %v2299_v53  ;;  %v2377_v15 = vmax.f32 %v2375_v34, %v2376_v17  ;;  %v2371_v32 = vrot.slane %v2370_v9, 1 }
 0x2c0   :  { %v2241_v19 = vpop.f32.mrf.mxu1 }
 0x2c1   :  { %v2300_v33 = vmax.f32 %v2240_v42, 0.0  ;;  %v2381_v61 = vrot.slane %v2380_v16, 4  ;;  %v2378_v1 = vrot.slane %v2377_v15, 1 }
 0x2c2   :  { %v2242_v59 = vpop.f32.mrf.mxu1 }
 0x2c3   :  { %v2243_v4 = vadd.f32 %v4736_v47, %v2242_v59  ;;  %v2382_v37 = vmax.f32 %v2380_v16, %v2381_v61  ;;  %v2379_v38 = vmax.f32 %v2377_v15, %v2378_v1 }
 0x2c4   :  { %v2244_v25 = vpop.f32.mrf.mxu1 }
 0x2c5   :  { %v2301_v51 = vmax.f32 %v2243_v4, 0.0  ;;  %v2383_v50 = vrot.slane %v2382_v37, 2  ;;  %v2431_v31 = vpack.c.bf16 %v2379_v38, %v2379_v38 }
 0x2c6   :  { %v2247_v18 = vpop.f32.mrf.mxu1 }
 0x2c7   :  { %v2248_v7 = vadd.f32 %v4736_v47, %v2247_v18  ;;  %v2387_v28 = vmax.f32 %v2300_v33, %v2301_v51  ;;  %v2384_v4 = vmax.f32 %v2382_v37, %v2383_v50  ;;  %v2486_v34 = vunpack.c.l.b16 %v2431_v31 }
 0x2c8   :  { %v2249_v52 = vpop.f32.mrf.mxu1 }
 0x2c9   :  { %v2302_v60 = vmax.f32 %v2248_v7, 0.0  ;;  %v2388_v14 = vrot.slane %v2387_v28, 4  ;;  %v2385_v51 = vrot.slane %v2384_v4, 1 }
 0x2ca   :  { %v2250_v39 = vpop.f32.mrf.mxu1 }
 0x2cb   :  { %v2251_v0 = vadd.f32 %v4736_v47, %v2250_v39  ;;  %v2389_v21 = vmax.f32 %v2387_v28, %v2388_v14  ;;  %v2386_v28 = vmax.f32 %v2384_v4, %v2385_v51 }
 0x2cc   :  { %v2252_v2 = vpop.f32.mrf.mxu1 }
 0x2cd   :  { %v2303_v5 = vmax.f32 %v2251_v0, 0.0  ;;  %v2390_v19 = vrot.slane %v2389_v21, 2 }
 0x2ce   :  { %v2255_v24 = vpop.f32.mrf.mxu1 }
 0x2cf   :  { %v2256_v10 = vadd.f32 %v4736_v47, %v2255_v24  ;;  %v2394_v40 = vmax.f32 %v2302_v60, %v2303_v5  ;;  %v2391_v63 = vmax.f32 %v2389_v21, %v2390_v19 }
 0x2d0   :  { %v2257_v46 = vpop.f32.mrf.mxu1 }
 0x2d1   :  { %v2304_v58 = vmax.f32 %v2256_v10, 0.0  ;;  %v2395_v57 = vrot.slane %v2394_v40, 4  ;;  %v2392_v30 = vrot.slane %v2391_v63, 1  ;;  %v2372_v10 = vmax.f32 %v2370_v9, %v2371_v32 }
 0x2d2   :  { %v2258_v45 = vpop.f32.mrf.mxu1 }
 0x2d3   :  { %v2259_v27 = vadd.f32 %v4736_v47, %v2258_v45  ;;  %v2396_v22 = vmax.f32 %v2394_v40, %v2395_v57  ;;  %v2393_v40 = vmax.f32 %v2391_v63, %v2392_v30 }
 0x2d4   :  { %v2260_v6 = vpop.f32.mrf.mxu1 }
 0x2d5   :  { %v2305_v8 = vmax.f32 %v2259_v27, 0.0  ;;  %v2397_v18 = vrot.slane %v2396_v22, 2  ;;  %v2432_v6 = vpack.c.bf16 %v2386_v28, %v2386_v28 }
 0x2d6   :  { %v2263_v29 = vpop.f32.mrf.mxu1 }
 0x2d7   :  { %v2401_v62 = vmax.f32 %v2304_v58, %v2305_v8  ;;  %v2264_v54 = vadd.f32 %v4736_v47, %v2263_v29  ;;  %v2398_v42 = vmax.f32 %v2396_v22, %v2397_v18  ;;  %v2430_v58 = vpack.c.bf16 %v2372_v10, %v2372_v10 }
 0x2d8   :  { %v2265_v35 = vpop.f32.mrf.mxu1  ;;  %v2433_v8 = vpack.c.bf16 %v2393_v40, %v2393_v40  ;;  %v2487_v37 = vunpack.c.l.b16 %v2432_v6 }
 0x2d9   :  { %v2402_v55 = vrot.slane %v2401_v62, 4  ;;  %v2306_v59 = vmax.f32 %v2264_v54, 0.0  ;;  %v2399_v33 = vrot.slane %v2398_v42, 1  ;;  %v2485_v21 = vunpack.c.l.b16 %v2430_v58 }
 0x2da   :  { %v2266_v3 = vpop.f32.mrf.mxu1 }
 0x2db   :  { %v2403_v49 = vmax.f32 %v2401_v62, %v2402_v55  ;;  %v2267_v12 = vadd.f32 %v4736_v47, %v2266_v3  ;;  %v2400_v27 = vmax.f32 %v2398_v42, %v2399_v33  ;;  %v2488_v55 = vunpack.c.l.b16 %v2433_v8 }
 0x2dc   :  { %v2268_v13 = vpop.f32.mrf.mxu1  ;;  %v2507_v3 = vsel %vm2493_vm11, %v2486_v34, %v2485_v21 }
 0x2dd   :  { %v2307_v25 = vmax.f32 %v2267_v12, 0.0  ;;  %v2404_v20 = vrot.slane %v2403_v49, 2  ;;  %v2434_v29 = vpack.c.bf16 %v2400_v27, %v2400_v27  ;;  %v2508_v12 = vsel %vm2495_vm5, %v2487_v37, %v2507_v3 }
 0x2de   :  { %v2271_v23 = vpop.f32.mrf.mxu1  ;;  %v2509_v50 = vsel %vm2497_vm8, %v2488_v55, %v2508_v12 }
 0x2df   :  { %v2408_v52 = vmax.f32 %v2306_v59, %v2307_v25  ;;  %v2272_v26 = vadd.f32 %v4736_v47, %v2271_v23  ;;  %v2405_v53 = vmax.f32 %v2403_v49, %v2404_v20  ;;  %v2489_v22 = vunpack.c.l.b16 %v2434_v29  ;;  %v2696_v20 = vld [vmem:[%s4817_s6] ss:$0 sm:$0xff] }
 0x2e0   :  { %v2273_v36 = vpop.f32.mrf.mxu1 }
 0x2e1   :  { %v2409_v39 = vrot.slane %v2408_v52, 4  ;;  %v2308_v24 = vmax.f32 %v2272_v26, 0.0  ;;  %v2406_v16 = vrot.slane %v2405_v53, 1  ;;  %v2510_v19 = vsel %vm2499_vm7, %v2489_v22, %v2509_v50 }
 0x2e2   :  { %v2274_v0 = vpop.f32.mrf.mxu1 }
 0x2e3   :  { %v2410_v7 = vmax.f32 %v2408_v52, %v2409_v39  ;;  %v2275_v2 = vadd.f32 %v4736_v47, %v2274_v0  ;;  %v2407_v47 = vmax.f32 %v2405_v53, %v2406_v16 }
 0x2e4   :  { %v2276_v56 = vpop.f32.mrf.mxu1 }
 0x2e5   :  { %v2411_v5 = vrot.slane %v2410_v7, 2  ;;  %v2309_v44 = vmax.f32 %v2275_v2, 0.0  ;;  %v2435_v62 = vpack.c.bf16 %v2407_v47, %v2407_v47 }
 0x2e7   :  { %v2412_v60 = vmax.f32 %v2410_v7, %v2411_v5  ;;  %v2415_v46 = vmax.f32 %v2308_v24, %v2309_v44  ;;  %v2490_v17 = vunpack.c.l.b16 %v2435_v62 }
 0x2e9   :  { %v2413_v45 = vrot.slane %v2412_v60, 1  ;;  %v2416_v11 = vrot.slane %v2415_v46, 4  ;;  %v2511_v59 = vsel %vm2501_vm12, %v2490_v17, %v2510_v19 }
 0x2eb   :  { %v2417_v61 = vmax.f32 %v2415_v46, %v2416_v11  ;;  %v2414_v14 = vmax.f32 %v2412_v60, %v2413_v45 }
 0x2ed   :  { %v2418_v57 = vrot.slane %v2417_v61, 2  ;;  %v2436_v35 = vpack.c.bf16 %v2414_v14, %v2414_v14 }
 0x2ef   :  { %v2419_v48 = vmax.f32 %v2417_v61, %v2418_v57  ;;  %v2491_v43 = vunpack.c.l.b16 %v2436_v35 }
 0x2f1   :  { %v2420_v54 = vrot.slane %v2419_v48, 1  ;;  %v2512_v18 = vsel %vm2503_vm3, %v2491_v43, %v2511_v59 }
 0x2f3   :  { %v2421_v49 = vmax.f32 %v2419_v48, %v2420_v54 }
 0x2f5   :  { %v2437_v13 = vpack.c.bf16 %v2421_v49, %v2421_v49 }
 0x2f7   :  { %v2492_v25 = vunpack.c.l.b16 %v2437_v13 }
 0x2f9   :  { %v2513_v23 = vsel %vm2505_vm14, %v2492_v25, %v2512_v18 }
 0x2fa   :  { %v2514_v15 = vpack.c.b16 %v2513_v23, %v4776_v41 }
 0x2fc   :  { %2884 = vmatmul.mubr.bf16.vlgmr.msra.gmra.mxu0 %v2514_v15 }
 0x3bc   :  { %v2598_v52 = vpop.f32.mrf.mxu0 }
 0x3bd   :  { %v2599_v9 = vadd.f32 %v2696_v20, %v2598_v52 }
 0x3be   :  { %v2885_v4 = vpop.f32.mrf.mxu0 }
 0x3bf   :  { %2605 = vst [vmem:[%s4818_s7] sm:$0xff] %v2599_v9 }
 0x3c0   :  { %v2601_v36 = vpop.f32.mrf.mxu0 }
 0x3c1   :  { %v2602_v63 = vadd.f32 %v2696_v20, %v2601_v36 }
 0x3c2   :  { %v2886_v39 = vpop.f32.mrf.mxu0 }
 0x3c3   :  { %2606 = vst [vmem:[%s4818_s7 + $0x8] sm:$0xff] %v2602_v63 }

</bundles_post_ra>
